<compile_context>
chip_gen: v7x
topology: tpu7x:2x2x1
jax: 0.10.0
libtpu: 0.0.40
codegen_flags: <defaults>
</compile_context>

<pallas_src>
import jax
import jax.numpy as jnp
import numpy as np
from jax.experimental import pallas as pl
from jax.experimental.pallas import tpu as pltpu


def decoder_kernel(ids_ref, emb_ref, wih_ref, whh_ref, bias_ref,
                   h0_ref, c0_ref, fcw_ref, fcb_ref,
                   pred_ref, state_ref):
    V, E = emb_ref.shape
    L = wih_ref.shape[0]
    H = whh_ref.shape[1]
    O = fcw_ref.shape[1]
    B = h0_ref.shape[1]
    S = ids_ref.shape[0] // B          # ids are time-major flattened: row = t*B + b

    # ---- embedding: one-hot matmul on the MXU (no scalar gather loop) ----
    lane_iota = jax.lax.broadcasted_iota(jnp.int32, (S * B, V), 1)
    onehot = (lane_iota == ids_ref[...]).astype(jnp.float32)                # (S*B, V)
    x = jnp.dot(onehot, emb_ref[...], preferred_element_type=jnp.float32)   # (S*B, E)

    hs, cs = [], []
    for l in range(L):
        w_ih = wih_ref[l]              # (E, 4H)
        w_hh = whh_ref[l]              # (H, 4H)
        bias = bias_ref[l]             # (1, 4H)  (b_ih + b_hh combined on host)

        # Hoisted input-to-hidden GEMM over the whole sequence (one big matmul
        # instead of S tiny ones); bias broadcast done once per layer.
        gx = jnp.dot(x, w_ih, preferred_element_type=jnp.float32) + bias    # (S*B, 4H)

        # Loop-carried state stays in vregs; no per-step VMEM round trips.
        h = h0_ref[l]                  # (B, H)
        c = c0_ref[l]
        outs = []
        # TODO(synk): stage w_hh in MXU weight registers once per layer
        # (pltpu.matmul_push_rhs / matmul_acc_lhs / matmul_pop) instead of
        # re-pushing the identical RHS every step; and for larger S/B switch to
        # lax.fori_loop over a (S*B, 4H) VMEM gx scratch to bound vreg liveness.
        for t in range(S):
            gates = gx[t * B:(t + 1) * B, :] + jnp.dot(
                h, w_hh, preferred_element_type=jnp.float32)                # (B, 4H)
            sig = jax.nn.sigmoid(gates)       # one full-lane (128) EUP pass
            th = jnp.tanh(gates)              # one full-lane (128) EUP pass
            i_g = sig[:, 0 * H:1 * H]
            f_g = sig[:, 1 * H:2 * H]
            g_g = th[:, 2 * H:3 * H]
            o_g = sig[:, 3 * H:4 * H]
            c = f_g * c + i_g * g_g
            h = o_g * jnp.tanh(c)
            outs.append(h)

        hs.append(h)
        cs.append(c)
        # Time-major stacking: plain sublane concat of the already-live h vregs.
        x = jnp.concatenate(outs, axis=0)     # (S*B, H), row = t*B + b

    # ---- fc + softmax (single GEMM over all timesteps) ----
    logits = jnp.dot(x, fcw_ref[...],
                     preferred_element_type=jnp.float32) + fcb_ref[...]     # (S*B, O)
    m = jnp.max(logits, axis=-1, keepdims=True)
    e = jnp.exp(logits - m)
    denom = jnp.sum(e, axis=-1, keepdims=True)
    probs = e * pl.reciprocal(denom, approx=True)        # divide on the EUP slot

    # Single time-major -> batch-major reorder, emitted as a lane-dense (B, S*O)
    # store (lane concat of the S per-timestep (B, O) blocks).
    pred_ref[...] = jnp.concatenate(
        [probs[t * B:(t + 1) * B, :] for t in range(S)], axis=1)            # (B, S*O)

    # Packed final states [h_0..h_{L-1}, c_0..c_{L-1}]: lane-dense (B, 2*L*H).
    state_ref[...] = jnp.concatenate(hs + cs, axis=1)


def make_decoder(params, B, S):
    """Builds a jitted callable (x_ids, h0, c0) -> (pred, hidden_, cell_)."""
    emb, w_ih, w_hh, b_ih, b_hh, fc_w, fc_b = params["tensors"]
    V, E = emb.shape
    L = w_ih.shape[0]
    H = w_hh.shape[2]
    O = fc_w.shape[0]

    # Host-side glue: pre-transpose weights so every in-kernel matmul is a
    # plain row-major (rows, in) @ (in, out); combine the two biases once.
    wih_t = jnp.transpose(w_ih, (0, 2, 1))          # (L, E, 4H)
    whh_t = jnp.transpose(w_hh, (0, 2, 1))          # (L, H, 4H)
    bias = (b_ih + b_hh).reshape(L, 1, 4 * H)       # (L, 1, 4H)
    fcw_t = fc_w.T                                  # (H, O)
    fcb = fc_b.reshape(1, O)

    vmem = pl.BlockSpec(memory_space=pltpu.MemorySpace.VMEM)

    # Single kernel invocation (empty grid): at B=2 a batch grid is a sequential
    # loop on v5e/v6e and <8 rows/core on v7x, so one step with tb=B wins.
    # TODO(synk): for B >= 16 reintroduce a batch-tiled grid with
    # dimension_semantics=("parallel",) so v7x can use both TensorCores.
    # TODO(synk): for a realistic vocab keep `emb` in HBM (memory_space=pl.ANY)
    # and DMA only the S*B needed rows instead of whole-table VMEM residency.
    call = pl.pallas_call(
        decoder_kernel,
        out_shape=(
            jax.ShapeDtypeStruct((B, S * O), jnp.float32),       # pred, lane-dense
            jax.ShapeDtypeStruct((B, 2 * L * H), jnp.float32),   # packed hn|cn
        ),
        in_specs=[
            vmem,   # ids, time-major flattened (S*B, 1) int32
            vmem,   # embedding table (V, E)
            vmem,   # w_ih (L, E, 4H)
            vmem,   # w_hh (L, H, 4H)
            vmem,   # bias (L, 1, 4H)
            vmem,   # h0 (L, B, H)
            vmem,   # c0 (L, B, H)
            vmem,   # fc weight (H, O)
            vmem,   # fc bias (1, O)
        ],
        out_specs=(vmem, vmem),
    )

    def run(x_ids, h0, c0):
        # Time-major flattened ids (row r = t*B + b); h0/c0 stay in PyTorch's
        # (L, B, H) layout (kernel indexes h0_ref[l]).
        ids_tm = jnp.transpose(x_ids, (1, 0)).reshape(S * B, 1).astype(jnp.int32)
        pred_p, state = call(ids_tm, emb, wih_t, whh_t, bias, h0, c0, fcw_t, fcb)
        pred = pred_p.reshape(B, S, O)
        hn = jnp.transpose(state[:, :L * H].reshape(B, L, H), (1, 0, 2))
        cn = jnp.transpose(state[:, L * H:].reshape(B, L, H), (1, 0, 2))
        return pred, hn, cn

    return jax.jit(run)


def decoder_ref(x_ids, params, h0, c0):
    """Pure-JAX reference (mirrors PyTorch semantics), high-precision matmuls."""
    emb, w_ih, w_hh, b_ih, b_hh, fc_w, fc_b = params["tensors"]
    L = w_ih.shape[0]
    H = w_hh.shape[2]
    hi = jax.lax.Precision.HIGHEST
    seq = emb[x_ids]                                # (B, S, E)
    hs, cs = [], []
    for l in range(L):
        h, c = h0[l], c0[l]
        outs = []
        for t in range(seq.shape[1]):
            g = (jnp.dot(seq[:, t], w_ih[l].T, precision=hi)
                 + jnp.dot(h, w_hh[l].T, precision=hi) + b_ih[l] + b_hh[l])
            i_g = jax.nn.sigmoid(g[:, :H])
            f_g = jax.nn.sigmoid(g[:, H:2 * H])
            g_g = jnp.tanh(g[:, 2 * H:3 * H])
            o_g = jax.nn.sigmoid(g[:, 3 * H:])
            c = f_g * c + i_g * g_g
            h = o_g * jnp.tanh(c)
            outs.append(h)
        seq = jnp.stack(outs, axis=1)
        hs.append(h)
        cs.append(c)
    logits = jnp.dot(seq, fc_w.T, precision=hi) + fc_b
    pred = jax.nn.softmax(logits, axis=-1)
    return pred, jnp.stack(hs), jnp.stack(cs)


def init_params(key, V, E, H, O, L):
    assert E == H, "embedding_size must equal hidden_size so layer weights stack"
    ks = jax.random.split(key, 8)
    k = 1.0 / np.sqrt(H)
    emb = jax.random.normal(ks[0], (V, E), jnp.float32) * 0.1
    w_ih = jax.random.uniform(ks[1], (L, 4 * H, E), jnp.float32, -k, k)
    w_hh = jax.random.uniform(ks[2], (L, 4 * H, H), jnp.float32, -k, k)
    b_ih = jax.random.uniform(ks[3], (L, 4 * H), jnp.float32, -k, k)
    b_hh = jax.random.uniform(ks[4], (L, 4 * H), jnp.float32, -k, k)
    fc_w = jax.random.uniform(ks[5], (O, H), jnp.float32, -k, k)
    fc_b = jax.random.uniform(ks[6], (O,), jnp.float32, -k, k)
    return {"tensors": (emb, w_ih, w_hh, b_ih, b_hh, fc_w, fc_b)}


if __name__ == "__main__":
    # small, module-consistent shapes
    B, S = 2, 8                 # batch, decode sequence length
    V = 16                      # input_size (vocab)
    E = 32                      # embedding_size
    H = 32                      # hidden_size
    O = 16                      # output_size
    L = 2                       # num_layers

    root = jax.random.PRNGKey(0)
    k_p, k_x, k_h, k_c = jax.random.split(root, 4)

    params = init_params(k_p, V, E, H, O, L)
    x_ids = jax.random.randint(k_x, (B, S), 0, V, dtype=jnp.int32)
    h0 = jax.random.normal(k_h, (L, B, H), jnp.float32) * 0.1
    c0 = jax.random.normal(k_c, (L, B, H), jnp.float32) * 0.1

    run = make_decoder(params, B, S)
    pred, hidden_, cell_ = run(x_ids, h0, c0)
    jax.block_until_ready((pred, hidden_, cell_))

    # Slack covers the MXU f32 matmul path and the EUP approx reciprocal in the
    # softmax normalization.
    pred_r, hid_r, cell_r = decoder_ref(x_ids, params, h0, c0)
    np.testing.assert_allclose(np.asarray(pred), np.asarray(pred_r), atol=5e-3, rtol=5e-3)
    np.testing.assert_allclose(np.asarray(hidden_), np.asarray(hid_r), atol=5e-3, rtol=5e-3)
    np.testing.assert_allclose(np.asarray(cell_), np.asarray(cell_r), atol=5e-3, rtol=5e-3)
    assert pred.shape == (B, S, O)
    assert hidden_.shape == (L, B, H) and cell_.shape == (L, B, H)

    print("KERNEL_OK")
</pallas_src>

<mosaic_0001>
module attributes {stable_mosaic.version = 11 : i64} {
  func.func @decoder_kernel(%arg0: memref<16x1xi32, #tpu.memory_space<vmem>>, %arg1: memref<16x32xf32, #tpu.memory_space<vmem>>, %arg2: memref<2x32x128xf32, #tpu.memory_space<vmem>>, %arg3: memref<2x32x128xf32, #tpu.memory_space<vmem>>, %arg4: memref<2x1x128xf32, #tpu.memory_space<vmem>>, %arg5: memref<2x2x32xf32, #tpu.memory_space<vmem>>, %arg6: memref<2x2x32xf32, #tpu.memory_space<vmem>>, %arg7: memref<32x16xf32, #tpu.memory_space<vmem>>, %arg8: memref<1x16xf32, #tpu.memory_space<vmem>>, %arg9: memref<2x128xf32, #tpu.memory_space<vmem>>, %arg10: memref<2x128xf32, #tpu.memory_space<vmem>>) attributes {dimension_semantics = [], scalar_prefetch = 0 : i64, scratch_operands = 0 : i64, tpu.core_type = #tpu.core_type<tc>} {
    %0 = tpu.iota {dimensions = array<i32: 1>} : vector<16x16xi32>
    %c0 = arith.constant 0 : index
    %c0_0 = arith.constant 0 : index
    %1 = vector.load %arg0[%c0, %c0_0] : memref<16x1xi32, #tpu.memory_space<vmem>>, vector<16x1xi32>
    %2 = vector.broadcast %1 : vector<16x1xi32> to vector<16x16xi32>
    %3 = arith.cmpi eq, %0, %2 : vector<16x16xi32>
    %4 = arith.extui %3 : vector<16x16xi1> to vector<16x16xi32>
    %5 = arith.sitofp %4 : vector<16x16xi32> to vector<16x16xf32>
    %c0_1 = arith.constant 0 : index
    %c0_2 = arith.constant 0 : index
    %6 = vector.load %arg1[%c0_1, %c0_2] : memref<16x32xf32, #tpu.memory_space<vmem>>, vector<16x32xf32>
    %cst = arith.constant dense<0.000000e+00> : vector<16x32xf32>
    %7 = tpu.matmul %5, %6, %cst {dimension_numbers = #tpu.dot_dimension_numbers<[1], [0], [0], [1], [0, 0, 1, 1], [], []>} : vector<16x16xf32>, vector<16x32xf32>, vector<16x32xf32> -> vector<16x32xf32>
    %c0_3 = arith.constant 0 : index
    %c0_4 = arith.constant 0 : index
    %c0_5 = arith.constant 0 : index
    %8 = vector.load %arg2[%c0_3, %c0_4, %c0_5] : memref<2x32x128xf32, #tpu.memory_space<vmem>>, vector<1x32x128xf32>
    %9 = vector.shape_cast %8 : vector<1x32x128xf32> to vector<32x128xf32>
    %c0_6 = arith.constant 0 : index
    %c0_7 = arith.constant 0 : index
    %c0_8 = arith.constant 0 : index
    %10 = vector.load %arg3[%c0_6, %c0_7, %c0_8] : memref<2x32x128xf32, #tpu.memory_space<vmem>>, vector<1x32x128xf32>
    %11 = vector.shape_cast %10 : vector<1x32x128xf32> to vector<32x128xf32>
    %c0_9 = arith.constant 0 : index
    %c0_10 = arith.constant 0 : index
    %c0_11 = arith.constant 0 : index
    %12 = vector.load %arg4[%c0_9, %c0_10, %c0_11] : memref<2x1x128xf32, #tpu.memory_space<vmem>>, vector<1x1x128xf32>
    %13 = vector.shape_cast %12 : vector<1x1x128xf32> to vector<1x128xf32>
    %cst_12 = arith.constant dense<0.000000e+00> : vector<16x128xf32>
    %14 = tpu.matmul %7, %9, %cst_12 {dimension_numbers = #tpu.dot_dimension_numbers<[1], [0], [0], [1], [0, 0, 1, 1], [], []>} : vector<16x32xf32>, vector<32x128xf32>, vector<16x128xf32> -> vector<16x128xf32>
    %15 = vector.broadcast %13 : vector<1x128xf32> to vector<16x128xf32>
    %16 = arith.addf %14, %15 : vector<16x128xf32>
    %c0_13 = arith.constant 0 : index
    %c0_14 = arith.constant 0 : index
    %c0_15 = arith.constant 0 : index
    %17 = vector.load %arg5[%c0_13, %c0_14, %c0_15] : memref<2x2x32xf32, #tpu.memory_space<vmem>>, vector<1x2x32xf32>
    %18 = vector.shape_cast %17 : vector<1x2x32xf32> to vector<2x32xf32>
    %c0_16 = arith.constant 0 : index
    %c0_17 = arith.constant 0 : index
    %c0_18 = arith.constant 0 : index
    %19 = vector.load %arg6[%c0_16, %c0_17, %c0_18] : memref<2x2x32xf32, #tpu.memory_space<vmem>>, vector<1x2x32xf32>
    %20 = vector.shape_cast %19 : vector<1x2x32xf32> to vector<2x32xf32>
    %21 = vector.extract_strided_slice %16 {offsets = [0, 0], sizes = [2, 128], strides = [1, 1]} : vector<16x128xf32> to vector<2x128xf32>
    %cst_19 = arith.constant dense<0.000000e+00> : vector<2x128xf32>
    %22 = tpu.matmul %18, %11, %cst_19 {dimension_numbers = #tpu.dot_dimension_numbers<[1], [0], [0], [1], [0, 0, 1, 1], [], []>} : vector<2x32xf32>, vector<32x128xf32>, vector<2x128xf32> -> vector<2x128xf32>
    %23 = arith.addf %21, %22 : vector<2x128xf32>
    %24 = arith.negf %23 : vector<2x128xf32>
    %25 = math.exp %24 : vector<2x128xf32>
    %cst_20 = arith.constant 1.000000e+00 : f32
    %26 = vector.broadcast %cst_20 : f32 to vector<2x128xf32>
    %27 = arith.addf %26, %25 : vector<2x128xf32>
    %28 = arith.divf %26, %27 : vector<2x128xf32>
    %29 = math.tanh %23 : vector<2x128xf32>
    %30 = vector.extract_strided_slice %28 {offsets = [0, 0], sizes = [2, 32], strides = [1, 1]} : vector<2x128xf32> to vector<2x32xf32>
    %31 = vector.extract_strided_slice %28 {offsets = [0, 32], sizes = [2, 32], strides = [1, 1]} : vector<2x128xf32> to vector<2x32xf32>
    %32 = vector.extract_strided_slice %29 {offsets = [0, 64], sizes = [2, 32], strides = [1, 1]} : vector<2x128xf32> to vector<2x32xf32>
    %33 = vector.extract_strided_slice %28 {offsets = [0, 96], sizes = [2, 32], strides = [1, 1]} : vector<2x128xf32> to vector<2x32xf32>
    %34 = arith.mulf %31, %20 : vector<2x32xf32>
    %35 = arith.mulf %30, %32 : vector<2x32xf32>
    %36 = arith.addf %34, %35 : vector<2x32xf32>
    %37 = math.tanh %36 : vector<2x32xf32>
    %38 = arith.mulf %33, %37 : vector<2x32xf32>
    %39 = vector.extract_strided_slice %16 {offsets = [2, 0], sizes = [2, 128], strides = [1, 1]} : vector<16x128xf32> to vector<2x128xf32>
    %cst_21 = arith.constant dense<0.000000e+00> : vector<2x128xf32>
    %40 = tpu.matmul %38, %11, %cst_21 {dimension_numbers = #tpu.dot_dimension_numbers<[1], [0], [0], [1], [0, 0, 1, 1], [], []>} : vector<2x32xf32>, vector<32x128xf32>, vector<2x128xf32> -> vector<2x128xf32>
    %41 = arith.addf %39, %40 : vector<2x128xf32>
    %42 = arith.negf %41 : vector<2x128xf32>
    %43 = math.exp %42 : vector<2x128xf32>
    %cst_22 = arith.constant 1.000000e+00 : f32
    %44 = vector.broadcast %cst_22 : f32 to vector<2x128xf32>
    %45 = arith.addf %44, %43 : vector<2x128xf32>
    %46 = arith.divf %44, %45 : vector<2x128xf32>
    %47 = math.tanh %41 : vector<2x128xf32>
    %48 = vector.extract_strided_slice %46 {offsets = [0, 0], sizes = [2, 32], strides = [1, 1]} : vector<2x128xf32> to vector<2x32xf32>
    %49 = vector.extract_strided_slice %46 {offsets = [0, 32], sizes = [2, 32], strides = [1, 1]} : vector<2x128xf32> to vector<2x32xf32>
    %50 = vector.extract_strided_slice %47 {offsets = [0, 64], sizes = [2, 32], strides = [1, 1]} : vector<2x128xf32> to vector<2x32xf32>
    %51 = vector.extract_strided_slice %46 {offsets = [0, 96], sizes = [2, 32], strides = [1, 1]} : vector<2x128xf32> to vector<2x32xf32>
    %52 = arith.mulf %49, %36 : vector<2x32xf32>
    %53 = arith.mulf %48, %50 : vector<2x32xf32>
    %54 = arith.addf %52, %53 : vector<2x32xf32>
    %55 = math.tanh %54 : vector<2x32xf32>
    %56 = arith.mulf %51, %55 : vector<2x32xf32>
    %57 = vector.extract_strided_slice %16 {offsets = [4, 0], sizes = [2, 128], strides = [1, 1]} : vector<16x128xf32> to vector<2x128xf32>
    %cst_23 = arith.constant dense<0.000000e+00> : vector<2x128xf32>
    %58 = tpu.matmul %56, %11, %cst_23 {dimension_numbers = #tpu.dot_dimension_numbers<[1], [0], [0], [1], [0, 0, 1, 1], [], []>} : vector<2x32xf32>, vector<32x128xf32>, vector<2x128xf32> -> vector<2x128xf32>
    %59 = arith.addf %57, %58 : vector<2x128xf32>
    %60 = arith.negf %59 : vector<2x128xf32>
    %61 = math.exp %60 : vector<2x128xf32>
    %cst_24 = arith.constant 1.000000e+00 : f32
    %62 = vector.broadcast %cst_24 : f32 to vector<2x128xf32>
    %63 = arith.addf %62, %61 : vector<2x128xf32>
    %64 = arith.divf %62, %63 : vector<2x128xf32>
    %65 = math.tanh %59 : vector<2x128xf32>
    %66 = vector.extract_strided_slice %64 {offsets = [0, 0], sizes = [2, 32], strides = [1, 1]} : vector<2x128xf32> to vector<2x32xf32>
    %67 = vector.extract_strided_slice %64 {offsets = [0, 32], sizes = [2, 32], strides = [1, 1]} : vector<2x128xf32> to vector<2x32xf32>
    %68 = vector.extract_strided_slice %65 {offsets = [0, 64], sizes = [2, 32], strides = [1, 1]} : vector<2x128xf32> to vector<2x32xf32>
    %69 = vector.extract_strided_slice %64 {offsets = [0, 96], sizes = [2, 32], strides = [1, 1]} : vector<2x128xf32> to vector<2x32xf32>
    %70 = arith.mulf %67, %54 : vector<2x32xf32>
    %71 = arith.mulf %66, %68 : vector<2x32xf32>
    %72 = arith.addf %70, %71 : vector<2x32xf32>
    %73 = math.tanh %72 : vector<2x32xf32>
    %74 = arith.mulf %69, %73 : vector<2x32xf32>
    %75 = vector.extract_strided_slice %16 {offsets = [6, 0], sizes = [2, 128], strides = [1, 1]} : vector<16x128xf32> to vector<2x128xf32>
    %cst_25 = arith.constant dense<0.000000e+00> : vector<2x128xf32>
    %76 = tpu.matmul %74, %11, %cst_25 {dimension_numbers = #tpu.dot_dimension_numbers<[1], [0], [0], [1], [0, 0, 1, 1], [], []>} : vector<2x32xf32>, vector<32x128xf32>, vector<2x128xf32> -> vector<2x128xf32>
    %77 = arith.addf %75, %76 : vector<2x128xf32>
    %78 = arith.negf %77 : vector<2x128xf32>
    %79 = math.exp %78 : vector<2x128xf32>
    %cst_26 = arith.constant 1.000000e+00 : f32
    %80 = vector.broadcast %cst_26 : f32 to vector<2x128xf32>
    %81 = arith.addf %80, %79 : vector<2x128xf32>
    %82 = arith.divf %80, %81 : vector<2x128xf32>
    %83 = math.tanh %77 : vector<2x128xf32>
    %84 = vector.extract_strided_slice %82 {offsets = [0, 0], sizes = [2, 32], strides = [1, 1]} : vector<2x128xf32> to vector<2x32xf32>
    %85 = vector.extract_strided_slice %82 {offsets = [0, 32], sizes = [2, 32], strides = [1, 1]} : vector<2x128xf32> to vector<2x32xf32>
    %86 = vector.extract_strided_slice %83 {offsets = [0, 64], sizes = [2, 32], strides = [1, 1]} : vector<2x128xf32> to vector<2x32xf32>
    %87 = vector.extract_strided_slice %82 {offsets = [0, 96], sizes = [2, 32], strides = [1, 1]} : vector<2x128xf32> to vector<2x32xf32>
    %88 = arith.mulf %85, %72 : vector<2x32xf32>
    %89 = arith.mulf %84, %86 : vector<2x32xf32>
    %90 = arith.addf %88, %89 : vector<2x32xf32>
    %91 = math.tanh %90 : vector<2x32xf32>
    %92 = arith.mulf %87, %91 : vector<2x32xf32>
    %93 = vector.extract_strided_slice %16 {offsets = [8, 0], sizes = [2, 128], strides = [1, 1]} : vector<16x128xf32> to vector<2x128xf32>
    %cst_27 = arith.constant dense<0.000000e+00> : vector<2x128xf32>
    %94 = tpu.matmul %92, %11, %cst_27 {dimension_numbers = #tpu.dot_dimension_numbers<[1], [0], [0], [1], [0, 0, 1, 1], [], []>} : vector<2x32xf32>, vector<32x128xf32>, vector<2x128xf32> -> vector<2x128xf32>
    %95 = arith.addf %93, %94 : vector<2x128xf32>
    %96 = arith.negf %95 : vector<2x128xf32>
    %97 = math.exp %96 : vector<2x128xf32>
    %cst_28 = arith.constant 1.000000e+00 : f32
    %98 = vector.broadcast %cst_28 : f32 to vector<2x128xf32>
    %99 = arith.addf %98, %97 : vector<2x128xf32>
    %100 = arith.divf %98, %99 : vector<2x128xf32>
    %101 = math.tanh %95 : vector<2x128xf32>
    %102 = vector.extract_strided_slice %100 {offsets = [0, 0], sizes = [2, 32], strides = [1, 1]} : vector<2x128xf32> to vector<2x32xf32>
    %103 = vector.extract_strided_slice %100 {offsets = [0, 32], sizes = [2, 32], strides = [1, 1]} : vector<2x128xf32> to vector<2x32xf32>
    %104 = vector.extract_strided_slice %101 {offsets = [0, 64], sizes = [2, 32], strides = [1, 1]} : vector<2x128xf32> to vector<2x32xf32>
    %105 = vector.extract_strided_slice %100 {offsets = [0, 96], sizes = [2, 32], strides = [1, 1]} : vector<2x128xf32> to vector<2x32xf32>
    %106 = arith.mulf %103, %90 : vector<2x32xf32>
    %107 = arith.mulf %102, %104 : vector<2x32xf32>
    %108 = arith.addf %106, %107 : vector<2x32xf32>
    %109 = math.tanh %108 : vector<2x32xf32>
    %110 = arith.mulf %105, %109 : vector<2x32xf32>
    %111 = vector.extract_strided_slice %16 {offsets = [10, 0], sizes = [2, 128], strides = [1, 1]} : vector<16x128xf32> to vector<2x128xf32>
    %cst_29 = arith.constant dense<0.000000e+00> : vector<2x128xf32>
    %112 = tpu.matmul %110, %11, %cst_29 {dimension_numbers = #tpu.dot_dimension_numbers<[1], [0], [0], [1], [0, 0, 1, 1], [], []>} : vector<2x32xf32>, vector<32x128xf32>, vector<2x128xf32> -> vector<2x128xf32>
    %113 = arith.addf %111, %112 : vector<2x128xf32>
    %114 = arith.negf %113 : vector<2x128xf32>
    %115 = math.exp %114 : vector<2x128xf32>
    %cst_30 = arith.constant 1.000000e+00 : f32
    %116 = vector.broadcast %cst_30 : f32 to vector<2x128xf32>
    %117 = arith.addf %116, %115 : vector<2x128xf32>
    %118 = arith.divf %116, %117 : vector<2x128xf32>
    %119 = math.tanh %113 : vector<2x128xf32>
    %120 = vector.extract_strided_slice %118 {offsets = [0, 0], sizes = [2, 32], strides = [1, 1]} : vector<2x128xf32> to vector<2x32xf32>
    %121 = vector.extract_strided_slice %118 {offsets = [0, 32], sizes = [2, 32], strides = [1, 1]} : vector<2x128xf32> to vector<2x32xf32>
    %122 = vector.extract_strided_slice %119 {offsets = [0, 64], sizes = [2, 32], strides = [1, 1]} : vector<2x128xf32> to vector<2x32xf32>
    %123 = vector.extract_strided_slice %118 {offsets = [0, 96], sizes = [2, 32], strides = [1, 1]} : vector<2x128xf32> to vector<2x32xf32>
    %124 = arith.mulf %121, %108 : vector<2x32xf32>
    %125 = arith.mulf %120, %122 : vector<2x32xf32>
    %126 = arith.addf %124, %125 : vector<2x32xf32>
    %127 = math.tanh %126 : vector<2x32xf32>
    %128 = arith.mulf %123, %127 : vector<2x32xf32>
    %129 = vector.extract_strided_slice %16 {offsets = [12, 0], sizes = [2, 128], strides = [1, 1]} : vector<16x128xf32> to vector<2x128xf32>
    %cst_31 = arith.constant dense<0.000000e+00> : vector<2x128xf32>
    %130 = tpu.matmul %128, %11, %cst_31 {dimension_numbers = #tpu.dot_dimension_numbers<[1], [0], [0], [1], [0, 0, 1, 1], [], []>} : vector<2x32xf32>, vector<32x128xf32>, vector<2x128xf32> -> vector<2x128xf32>
    %131 = arith.addf %129, %130 : vector<2x128xf32>
    %132 = arith.negf %131 : vector<2x128xf32>
    %133 = math.exp %132 : vector<2x128xf32>
    %cst_32 = arith.constant 1.000000e+00 : f32
    %134 = vector.broadcast %cst_32 : f32 to vector<2x128xf32>
    %135 = arith.addf %134, %133 : vector<2x128xf32>
    %136 = arith.divf %134, %135 : vector<2x128xf32>
    %137 = math.tanh %131 : vector<2x128xf32>
    %138 = vector.extract_strided_slice %136 {offsets = [0, 0], sizes = [2, 32], strides = [1, 1]} : vector<2x128xf32> to vector<2x32xf32>
    %139 = vector.extract_strided_slice %136 {offsets = [0, 32], sizes = [2, 32], strides = [1, 1]} : vector<2x128xf32> to vector<2x32xf32>
    %140 = vector.extract_strided_slice %137 {offsets = [0, 64], sizes = [2, 32], strides = [1, 1]} : vector<2x128xf32> to vector<2x32xf32>
    %141 = vector.extract_strided_slice %136 {offsets = [0, 96], sizes = [2, 32], strides = [1, 1]} : vector<2x128xf32> to vector<2x32xf32>
    %142 = arith.mulf %139, %126 : vector<2x32xf32>
    %143 = arith.mulf %138, %140 : vector<2x32xf32>
    %144 = arith.addf %142, %143 : vector<2x32xf32>
    %145 = math.tanh %144 : vector<2x32xf32>
    %146 = arith.mulf %141, %145 : vector<2x32xf32>
    %147 = vector.extract_strided_slice %16 {offsets = [14, 0], sizes = [2, 128], strides = [1, 1]} : vector<16x128xf32> to vector<2x128xf32>
    %cst_33 = arith.constant dense<0.000000e+00> : vector<2x128xf32>
    %148 = tpu.matmul %146, %11, %cst_33 {dimension_numbers = #tpu.dot_dimension_numbers<[1], [0], [0], [1], [0, 0, 1, 1], [], []>} : vector<2x32xf32>, vector<32x128xf32>, vector<2x128xf32> -> vector<2x128xf32>
    %149 = arith.addf %147, %148 : vector<2x128xf32>
    %150 = arith.negf %149 : vector<2x128xf32>
    %151 = math.exp %150 : vector<2x128xf32>
    %cst_34 = arith.constant 1.000000e+00 : f32
    %152 = vector.broadcast %cst_34 : f32 to vector<2x128xf32>
    %153 = arith.addf %152, %151 : vector<2x128xf32>
    %154 = arith.divf %152, %153 : vector<2x128xf32>
    %155 = math.tanh %149 : vector<2x128xf32>
    %156 = vector.extract_strided_slice %154 {offsets = [0, 0], sizes = [2, 32], strides = [1, 1]} : vector<2x128xf32> to vector<2x32xf32>
    %157 = vector.extract_strided_slice %154 {offsets = [0, 32], sizes = [2, 32], strides = [1, 1]} : vector<2x128xf32> to vector<2x32xf32>
    %158 = vector.extract_strided_slice %155 {offsets = [0, 64], sizes = [2, 32], strides = [1, 1]} : vector<2x128xf32> to vector<2x32xf32>
    %159 = vector.extract_strided_slice %154 {offsets = [0, 96], sizes = [2, 32], strides = [1, 1]} : vector<2x128xf32> to vector<2x32xf32>
    %160 = arith.mulf %157, %144 : vector<2x32xf32>
    %161 = arith.mulf %156, %158 : vector<2x32xf32>
    %162 = arith.addf %160, %161 : vector<2x32xf32>
    %163 = math.tanh %162 : vector<2x32xf32>
    %164 = arith.mulf %159, %163 : vector<2x32xf32>
    %165 = tpu.concatenate %38, %56, %74, %92, %110, %128, %146, %164 in 0 : vector<2x32xf32>, vector<2x32xf32>, vector<2x32xf32>, vector<2x32xf32>, vector<2x32xf32>, vector<2x32xf32>, vector<2x32xf32>, vector<2x32xf32> -> vector<16x32xf32>
    %c1 = arith.constant 1 : index
    %c0_35 = arith.constant 0 : index
    %c0_36 = arith.constant 0 : index
    %166 = vector.load %arg2[%c1, %c0_35, %c0_36] : memref<2x32x128xf32, #tpu.memory_space<vmem>>, vector<1x32x128xf32>
    %167 = vector.shape_cast %166 : vector<1x32x128xf32> to vector<32x128xf32>
    %c1_37 = arith.constant 1 : index
    %c0_38 = arith.constant 0 : index
    %c0_39 = arith.constant 0 : index
    %168 = vector.load %arg3[%c1_37, %c0_38, %c0_39] : memref<2x32x128xf32, #tpu.memory_space<vmem>>, vector<1x32x128xf32>
    %169 = vector.shape_cast %168 : vector<1x32x128xf32> to vector<32x128xf32>
    %c1_40 = arith.constant 1 : index
    %c0_41 = arith.constant 0 : index
    %c0_42 = arith.constant 0 : index
    %170 = vector.load %arg4[%c1_40, %c0_41, %c0_42] : memref<2x1x128xf32, #tpu.memory_space<vmem>>, vector<1x1x128xf32>
    %171 = vector.shape_cast %170 : vector<1x1x128xf32> to vector<1x128xf32>
    %cst_43 = arith.constant dense<0.000000e+00> : vector<16x128xf32>
    %172 = tpu.matmul %165, %167, %cst_43 {dimension_numbers = #tpu.dot_dimension_numbers<[1], [0], [0], [1], [0, 0, 1, 1], [], []>} : vector<16x32xf32>, vector<32x128xf32>, vector<16x128xf32> -> vector<16x128xf32>
    %173 = vector.broadcast %171 : vector<1x128xf32> to vector<16x128xf32>
    %174 = arith.addf %172, %173 : vector<16x128xf32>
    %c1_44 = arith.constant 1 : index
    %c0_45 = arith.constant 0 : index
    %c0_46 = arith.constant 0 : index
    %175 = vector.load %arg5[%c1_44, %c0_45, %c0_46] : memref<2x2x32xf32, #tpu.memory_space<vmem>>, vector<1x2x32xf32>
    %176 = vector.shape_cast %175 : vector<1x2x32xf32> to vector<2x32xf32>
    %c1_47 = arith.constant 1 : index
    %c0_48 = arith.constant 0 : index
    %c0_49 = arith.constant 0 : index
    %177 = vector.load %arg6[%c1_47, %c0_48, %c0_49] : memref<2x2x32xf32, #tpu.memory_space<vmem>>, vector<1x2x32xf32>
    %178 = vector.shape_cast %177 : vector<1x2x32xf32> to vector<2x32xf32>
    %179 = vector.extract_strided_slice %174 {offsets = [0, 0], sizes = [2, 128], strides = [1, 1]} : vector<16x128xf32> to vector<2x128xf32>
    %cst_50 = arith.constant dense<0.000000e+00> : vector<2x128xf32>
    %180 = tpu.matmul %176, %169, %cst_50 {dimension_numbers = #tpu.dot_dimension_numbers<[1], [0], [0], [1], [0, 0, 1, 1], [], []>} : vector<2x32xf32>, vector<32x128xf32>, vector<2x128xf32> -> vector<2x128xf32>
    %181 = arith.addf %179, %180 : vector<2x128xf32>
    %182 = arith.negf %181 : vector<2x128xf32>
    %183 = math.exp %182 : vector<2x128xf32>
    %cst_51 = arith.constant 1.000000e+00 : f32
    %184 = vector.broadcast %cst_51 : f32 to vector<2x128xf32>
    %185 = arith.addf %184, %183 : vector<2x128xf32>
    %186 = arith.divf %184, %185 : vector<2x128xf32>
    %187 = math.tanh %181 : vector<2x128xf32>
    %188 = vector.extract_strided_slice %186 {offsets = [0, 0], sizes = [2, 32], strides = [1, 1]} : vector<2x128xf32> to vector<2x32xf32>
    %189 = vector.extract_strided_slice %186 {offsets = [0, 32], sizes = [2, 32], strides = [1, 1]} : vector<2x128xf32> to vector<2x32xf32>
    %190 = vector.extract_strided_slice %187 {offsets = [0, 64], sizes = [2, 32], strides = [1, 1]} : vector<2x128xf32> to vector<2x32xf32>
    %191 = vector.extract_strided_slice %186 {offsets = [0, 96], sizes = [2, 32], strides = [1, 1]} : vector<2x128xf32> to vector<2x32xf32>
    %192 = arith.mulf %189, %178 : vector<2x32xf32>
    %193 = arith.mulf %188, %190 : vector<2x32xf32>
    %194 = arith.addf %192, %193 : vector<2x32xf32>
    %195 = math.tanh %194 : vector<2x32xf32>
    %196 = arith.mulf %191, %195 : vector<2x32xf32>
    %197 = vector.extract_strided_slice %174 {offsets = [2, 0], sizes = [2, 128], strides = [1, 1]} : vector<16x128xf32> to vector<2x128xf32>
    %cst_52 = arith.constant dense<0.000000e+00> : vector<2x128xf32>
    %198 = tpu.matmul %196, %169, %cst_52 {dimension_numbers = #tpu.dot_dimension_numbers<[1], [0], [0], [1], [0, 0, 1, 1], [], []>} : vector<2x32xf32>, vector<32x128xf32>, vector<2x128xf32> -> vector<2x128xf32>
    %199 = arith.addf %197, %198 : vector<2x128xf32>
    %200 = arith.negf %199 : vector<2x128xf32>
    %201 = math.exp %200 : vector<2x128xf32>
    %cst_53 = arith.constant 1.000000e+00 : f32
    %202 = vector.broadcast %cst_53 : f32 to vector<2x128xf32>
    %203 = arith.addf %202, %201 : vector<2x128xf32>
    %204 = arith.divf %202, %203 : vector<2x128xf32>
    %205 = math.tanh %199 : vector<2x128xf32>
    %206 = vector.extract_strided_slice %204 {offsets = [0, 0], sizes = [2, 32], strides = [1, 1]} : vector<2x128xf32> to vector<2x32xf32>
    %207 = vector.extract_strided_slice %204 {offsets = [0, 32], sizes = [2, 32], strides = [1, 1]} : vector<2x128xf32> to vector<2x32xf32>
    %208 = vector.extract_strided_slice %205 {offsets = [0, 64], sizes = [2, 32], strides = [1, 1]} : vector<2x128xf32> to vector<2x32xf32>
    %209 = vector.extract_strided_slice %204 {offsets = [0, 96], sizes = [2, 32], strides = [1, 1]} : vector<2x128xf32> to vector<2x32xf32>
    %210 = arith.mulf %207, %194 : vector<2x32xf32>
    %211 = arith.mulf %206, %208 : vector<2x32xf32>
    %212 = arith.addf %210, %211 : vector<2x32xf32>
    %213 = math.tanh %212 : vector<2x32xf32>
    %214 = arith.mulf %209, %213 : vector<2x32xf32>
    %215 = vector.extract_strided_slice %174 {offsets = [4, 0], sizes = [2, 128], strides = [1, 1]} : vector<16x128xf32> to vector<2x128xf32>
    %cst_54 = arith.constant dense<0.000000e+00> : vector<2x128xf32>
    %216 = tpu.matmul %214, %169, %cst_54 {dimension_numbers = #tpu.dot_dimension_numbers<[1], [0], [0], [1], [0, 0, 1, 1], [], []>} : vector<2x32xf32>, vector<32x128xf32>, vector<2x128xf32> -> vector<2x128xf32>
    %217 = arith.addf %215, %216 : vector<2x128xf32>
    %218 = arith.negf %217 : vector<2x128xf32>
    %219 = math.exp %218 : vector<2x128xf32>
    %cst_55 = arith.constant 1.000000e+00 : f32
    %220 = vector.broadcast %cst_55 : f32 to vector<2x128xf32>
    %221 = arith.addf %220, %219 : vector<2x128xf32>
    %222 = arith.divf %220, %221 : vector<2x128xf32>
    %223 = math.tanh %217 : vector<2x128xf32>
    %224 = vector.extract_strided_slice %222 {offsets = [0, 0], sizes = [2, 32], strides = [1, 1]} : vector<2x128xf32> to vector<2x32xf32>
    %225 = vector.extract_strided_slice %222 {offsets = [0, 32], sizes = [2, 32], strides = [1, 1]} : vector<2x128xf32> to vector<2x32xf32>
    %226 = vector.extract_strided_slice %223 {offsets = [0, 64], sizes = [2, 32], strides = [1, 1]} : vector<2x128xf32> to vector<2x32xf32>
    %227 = vector.extract_strided_slice %222 {offsets = [0, 96], sizes = [2, 32], strides = [1, 1]} : vector<2x128xf32> to vector<2x32xf32>
    %228 = arith.mulf %225, %212 : vector<2x32xf32>
    %229 = arith.mulf %224, %226 : vector<2x32xf32>
    %230 = arith.addf %228, %229 : vector<2x32xf32>
    %231 = math.tanh %230 : vector<2x32xf32>
    %232 = arith.mulf %227, %231 : vector<2x32xf32>
    %233 = vector.extract_strided_slice %174 {offsets = [6, 0], sizes = [2, 128], strides = [1, 1]} : vector<16x128xf32> to vector<2x128xf32>
    %cst_56 = arith.constant dense<0.000000e+00> : vector<2x128xf32>
    %234 = tpu.matmul %232, %169, %cst_56 {dimension_numbers = #tpu.dot_dimension_numbers<[1], [0], [0], [1], [0, 0, 1, 1], [], []>} : vector<2x32xf32>, vector<32x128xf32>, vector<2x128xf32> -> vector<2x128xf32>
    %235 = arith.addf %233, %234 : vector<2x128xf32>
    %236 = arith.negf %235 : vector<2x128xf32>
    %237 = math.exp %236 : vector<2x128xf32>
    %cst_57 = arith.constant 1.000000e+00 : f32
    %238 = vector.broadcast %cst_57 : f32 to vector<2x128xf32>
    %239 = arith.addf %238, %237 : vector<2x128xf32>
    %240 = arith.divf %238, %239 : vector<2x128xf32>
    %241 = math.tanh %235 : vector<2x128xf32>
    %242 = vector.extract_strided_slice %240 {offsets = [0, 0], sizes = [2, 32], strides = [1, 1]} : vector<2x128xf32> to vector<2x32xf32>
    %243 = vector.extract_strided_slice %240 {offsets = [0, 32], sizes = [2, 32], strides = [1, 1]} : vector<2x128xf32> to vector<2x32xf32>
    %244 = vector.extract_strided_slice %241 {offsets = [0, 64], sizes = [2, 32], strides = [1, 1]} : vector<2x128xf32> to vector<2x32xf32>
    %245 = vector.extract_strided_slice %240 {offsets = [0, 96], sizes = [2, 32], strides = [1, 1]} : vector<2x128xf32> to vector<2x32xf32>
    %246 = arith.mulf %243, %230 : vector<2x32xf32>
    %247 = arith.mulf %242, %244 : vector<2x32xf32>
    %248 = arith.addf %246, %247 : vector<2x32xf32>
    %249 = math.tanh %248 : vector<2x32xf32>
    %250 = arith.mulf %245, %249 : vector<2x32xf32>
    %251 = vector.extract_strided_slice %174 {offsets = [8, 0], sizes = [2, 128], strides = [1, 1]} : vector<16x128xf32> to vector<2x128xf32>
    %cst_58 = arith.constant dense<0.000000e+00> : vector<2x128xf32>
    %252 = tpu.matmul %250, %169, %cst_58 {dimension_numbers = #tpu.dot_dimension_numbers<[1], [0], [0], [1], [0, 0, 1, 1], [], []>} : vector<2x32xf32>, vector<32x128xf32>, vector<2x128xf32> -> vector<2x128xf32>
    %253 = arith.addf %251, %252 : vector<2x128xf32>
    %254 = arith.negf %253 : vector<2x128xf32>
    %255 = math.exp %254 : vector<2x128xf32>
    %cst_59 = arith.constant 1.000000e+00 : f32
    %256 = vector.broadcast %cst_59 : f32 to vector<2x128xf32>
    %257 = arith.addf %256, %255 : vector<2x128xf32>
    %258 = arith.divf %256, %257 : vector<2x128xf32>
    %259 = math.tanh %253 : vector<2x128xf32>
    %260 = vector.extract_strided_slice %258 {offsets = [0, 0], sizes = [2, 32], strides = [1, 1]} : vector<2x128xf32> to vector<2x32xf32>
    %261 = vector.extract_strided_slice %258 {offsets = [0, 32], sizes = [2, 32], strides = [1, 1]} : vector<2x128xf32> to vector<2x32xf32>
    %262 = vector.extract_strided_slice %259 {offsets = [0, 64], sizes = [2, 32], strides = [1, 1]} : vector<2x128xf32> to vector<2x32xf32>
    %263 = vector.extract_strided_slice %258 {offsets = [0, 96], sizes = [2, 32], strides = [1, 1]} : vector<2x128xf32> to vector<2x32xf32>
    %264 = arith.mulf %261, %248 : vector<2x32xf32>
    %265 = arith.mulf %260, %262 : vector<2x32xf32>
    %266 = arith.addf %264, %265 : vector<2x32xf32>
    %267 = math.tanh %266 : vector<2x32xf32>
    %268 = arith.mulf %263, %267 : vector<2x32xf32>
    %269 = vector.extract_strided_slice %174 {offsets = [10, 0], sizes = [2, 128], strides = [1, 1]} : vector<16x128xf32> to vector<2x128xf32>
    %cst_60 = arith.constant dense<0.000000e+00> : vector<2x128xf32>
    %270 = tpu.matmul %268, %169, %cst_60 {dimension_numbers = #tpu.dot_dimension_numbers<[1], [0], [0], [1], [0, 0, 1, 1], [], []>} : vector<2x32xf32>, vector<32x128xf32>, vector<2x128xf32> -> vector<2x128xf32>
    %271 = arith.addf %269, %270 : vector<2x128xf32>
    %272 = arith.negf %271 : vector<2x128xf32>
    %273 = math.exp %272 : vector<2x128xf32>
    %cst_61 = arith.constant 1.000000e+00 : f32
    %274 = vector.broadcast %cst_61 : f32 to vector<2x128xf32>
    %275 = arith.addf %274, %273 : vector<2x128xf32>
    %276 = arith.divf %274, %275 : vector<2x128xf32>
    %277 = math.tanh %271 : vector<2x128xf32>
    %278 = vector.extract_strided_slice %276 {offsets = [0, 0], sizes = [2, 32], strides = [1, 1]} : vector<2x128xf32> to vector<2x32xf32>
    %279 = vector.extract_strided_slice %276 {offsets = [0, 32], sizes = [2, 32], strides = [1, 1]} : vector<2x128xf32> to vector<2x32xf32>
    %280 = vector.extract_strided_slice %277 {offsets = [0, 64], sizes = [2, 32], strides = [1, 1]} : vector<2x128xf32> to vector<2x32xf32>
    %281 = vector.extract_strided_slice %276 {offsets = [0, 96], sizes = [2, 32], strides = [1, 1]} : vector<2x128xf32> to vector<2x32xf32>
    %282 = arith.mulf %279, %266 : vector<2x32xf32>
    %283 = arith.mulf %278, %280 : vector<2x32xf32>
    %284 = arith.addf %282, %283 : vector<2x32xf32>
    %285 = math.tanh %284 : vector<2x32xf32>
    %286 = arith.mulf %281, %285 : vector<2x32xf32>
    %287 = vector.extract_strided_slice %174 {offsets = [12, 0], sizes = [2, 128], strides = [1, 1]} : vector<16x128xf32> to vector<2x128xf32>
    %cst_62 = arith.constant dense<0.000000e+00> : vector<2x128xf32>
    %288 = tpu.matmul %286, %169, %cst_62 {dimension_numbers = #tpu.dot_dimension_numbers<[1], [0], [0], [1], [0, 0, 1, 1], [], []>} : vector<2x32xf32>, vector<32x128xf32>, vector<2x128xf32> -> vector<2x128xf32>
    %289 = arith.addf %287, %288 : vector<2x128xf32>
    %290 = arith.negf %289 : vector<2x128xf32>
    %291 = math.exp %290 : vector<2x128xf32>
    %cst_63 = arith.constant 1.000000e+00 : f32
    %292 = vector.broadcast %cst_63 : f32 to vector<2x128xf32>
    %293 = arith.addf %292, %291 : vector<2x128xf32>
    %294 = arith.divf %292, %293 : vector<2x128xf32>
    %295 = math.tanh %289 : vector<2x128xf32>
    %296 = vector.extract_strided_slice %294 {offsets = [0, 0], sizes = [2, 32], strides = [1, 1]} : vector<2x128xf32> to vector<2x32xf32>
    %297 = vector.extract_strided_slice %294 {offsets = [0, 32], sizes = [2, 32], strides = [1, 1]} : vector<2x128xf32> to vector<2x32xf32>
    %298 = vector.extract_strided_slice %295 {offsets = [0, 64], sizes = [2, 32], strides = [1, 1]} : vector<2x128xf32> to vector<2x32xf32>
    %299 = vector.extract_strided_slice %294 {offsets = [0, 96], sizes = [2, 32], strides = [1, 1]} : vector<2x128xf32> to vector<2x32xf32>
    %300 = arith.mulf %297, %284 : vector<2x32xf32>
    %301 = arith.mulf %296, %298 : vector<2x32xf32>
    %302 = arith.addf %300, %301 : vector<2x32xf32>
    %303 = math.tanh %302 : vector<2x32xf32>
    %304 = arith.mulf %299, %303 : vector<2x32xf32>
    %305 = vector.extract_strided_slice %174 {offsets = [14, 0], sizes = [2, 128], strides = [1, 1]} : vector<16x128xf32> to vector<2x128xf32>
    %cst_64 = arith.constant dense<0.000000e+00> : vector<2x128xf32>
    %306 = tpu.matmul %304, %169, %cst_64 {dimension_numbers = #tpu.dot_dimension_numbers<[1], [0], [0], [1], [0, 0, 1, 1], [], []>} : vector<2x32xf32>, vector<32x128xf32>, vector<2x128xf32> -> vector<2x128xf32>
    %307 = arith.addf %305, %306 : vector<2x128xf32>
    %308 = arith.negf %307 : vector<2x128xf32>
    %309 = math.exp %308 : vector<2x128xf32>
    %cst_65 = arith.constant 1.000000e+00 : f32
    %310 = vector.broadcast %cst_65 : f32 to vector<2x128xf32>
    %311 = arith.addf %310, %309 : vector<2x128xf32>
    %312 = arith.divf %310, %311 : vector<2x128xf32>
    %313 = math.tanh %307 : vector<2x128xf32>
    %314 = vector.extract_strided_slice %312 {offsets = [0, 0], sizes = [2, 32], strides = [1, 1]} : vector<2x128xf32> to vector<2x32xf32>
    %315 = vector.extract_strided_slice %312 {offsets = [0, 32], sizes = [2, 32], strides = [1, 1]} : vector<2x128xf32> to vector<2x32xf32>
    %316 = vector.extract_strided_slice %313 {offsets = [0, 64], sizes = [2, 32], strides = [1, 1]} : vector<2x128xf32> to vector<2x32xf32>
    %317 = vector.extract_strided_slice %312 {offsets = [0, 96], sizes = [2, 32], strides = [1, 1]} : vector<2x128xf32> to vector<2x32xf32>
    %318 = arith.mulf %315, %302 : vector<2x32xf32>
    %319 = arith.mulf %314, %316 : vector<2x32xf32>
    %320 = arith.addf %318, %319 : vector<2x32xf32>
    %321 = math.tanh %320 : vector<2x32xf32>
    %322 = arith.mulf %317, %321 : vector<2x32xf32>
    %323 = tpu.concatenate %196, %214, %232, %250, %268, %286, %304, %322 in 0 : vector<2x32xf32>, vector<2x32xf32>, vector<2x32xf32>, vector<2x32xf32>, vector<2x32xf32>, vector<2x32xf32>, vector<2x32xf32>, vector<2x32xf32> -> vector<16x32xf32>
    %c0_66 = arith.constant 0 : index
    %c0_67 = arith.constant 0 : index
    %324 = vector.load %arg7[%c0_66, %c0_67] : memref<32x16xf32, #tpu.memory_space<vmem>>, vector<32x16xf32>
    %cst_68 = arith.constant dense<0.000000e+00> : vector<16x16xf32>
    %325 = tpu.matmul %323, %324, %cst_68 {dimension_numbers = #tpu.dot_dimension_numbers<[1], [0], [0], [1], [0, 0, 1, 1], [], []>} : vector<16x32xf32>, vector<32x16xf32>, vector<16x16xf32> -> vector<16x16xf32>
    %c0_69 = arith.constant 0 : index
    %c0_70 = arith.constant 0 : index
    %326 = vector.load %arg8[%c0_69, %c0_70] : memref<1x16xf32, #tpu.memory_space<vmem>>, vector<1x16xf32>
    %327 = vector.broadcast %326 : vector<1x16xf32> to vector<16x16xf32>
    %328 = arith.addf %325, %327 : vector<16x16xf32>
    %cst_71 = arith.constant dense<0xFF800000> : vector<16xf32>
    %329 = vector.multi_reduction <maximumf>, %328, %cst_71 [1] : vector<16x16xf32> to vector<16xf32>
    %330 = vector.shape_cast %329 : vector<16xf32> to vector<16x1xf32>
    %331 = vector.broadcast %330 : vector<16x1xf32> to vector<16x16xf32>
    %332 = arith.subf %328, %331 : vector<16x16xf32>
    %333 = math.exp %332 : vector<16x16xf32>
    %cst_72 = arith.constant dense<0.000000e+00> : vector<16xf32>
    %334 = vector.multi_reduction <add>, %333, %cst_72 [1] : vector<16x16xf32> to vector<16xf32>
    %335 = vector.shape_cast %334 : vector<16xf32> to vector<16x1xf32>
    %336 = tpu.reciprocal %335 {approx = true} : vector<16x1xf32> -> vector<16x1xf32>
    %337 = vector.broadcast %336 : vector<16x1xf32> to vector<16x16xf32>
    %338 = arith.mulf %333, %337 : vector<16x16xf32>
    %339 = vector.extract_strided_slice %338 {offsets = [0, 0], sizes = [2, 16], strides = [1, 1]} : vector<16x16xf32> to vector<2x16xf32>
    %340 = vector.extract_strided_slice %338 {offsets = [2, 0], sizes = [2, 16], strides = [1, 1]} : vector<16x16xf32> to vector<2x16xf32>
    %341 = vector.extract_strided_slice %338 {offsets = [4, 0], sizes = [2, 16], strides = [1, 1]} : vector<16x16xf32> to vector<2x16xf32>
    %342 = vector.extract_strided_slice %338 {offsets = [6, 0], sizes = [2, 16], strides = [1, 1]} : vector<16x16xf32> to vector<2x16xf32>
    %343 = vector.extract_strided_slice %338 {offsets = [8, 0], sizes = [2, 16], strides = [1, 1]} : vector<16x16xf32> to vector<2x16xf32>
    %344 = vector.extract_strided_slice %338 {offsets = [10, 0], sizes = [2, 16], strides = [1, 1]} : vector<16x16xf32> to vector<2x16xf32>
    %345 = vector.extract_strided_slice %338 {offsets = [12, 0], sizes = [2, 16], strides = [1, 1]} : vector<16x16xf32> to vector<2x16xf32>
    %346 = vector.extract_strided_slice %338 {offsets = [14, 0], sizes = [2, 16], strides = [1, 1]} : vector<16x16xf32> to vector<2x16xf32>
    %347 = tpu.concatenate %339, %340, %341, %342, %343, %344, %345, %346 in 1 : vector<2x16xf32>, vector<2x16xf32>, vector<2x16xf32>, vector<2x16xf32>, vector<2x16xf32>, vector<2x16xf32>, vector<2x16xf32>, vector<2x16xf32> -> vector<2x128xf32>
    %c0_73 = arith.constant 0 : index
    %c0_74 = arith.constant 0 : index
    %348 = vector.load %arg9[%c0_73, %c0_74] : memref<2x128xf32, #tpu.memory_space<vmem>>, vector<2x128xf32>
    tpu.vector_store %arg9[%c0_73, %c0_74], %347 {strides = array<i32>} : memref<2x128xf32, #tpu.memory_space<vmem>>, vector<2x128xf32>,
    %349 = tpu.concatenate %164, %322, %162, %320 in 1 : vector<2x32xf32>, vector<2x32xf32>, vector<2x32xf32>, vector<2x32xf32> -> vector<2x128xf32>
    %c0_75 = arith.constant 0 : index
    %c0_76 = arith.constant 0 : index
    %350 = vector.load %arg10[%c0_75, %c0_76] : memref<2x128xf32, #tpu.memory_space<vmem>>, vector<2x128xf32>
    tpu.vector_store %arg10[%c0_75, %c0_76], %349 {strides = array<i32>} : memref<2x128xf32, #tpu.memory_space<vmem>>, vector<2x128xf32>,
    return
  }
}

</mosaic_0001>

<bundles_post_ra>
// kernel: run.1
= control target key start
LH: loop header
LB: loop body
LE: loop exit
PB: predicated region body
PF: predicated region fallthrough
CT: control target
= control target key end

     0   :  { %16 = vsyncpa [#allocation3], 0  ;;  %s3381_s0 = inlined_call_operand.vmem [shape: s32[16,1], index: 0, kind: input, shape index: {}]   ;;  %s3382_s1 = inlined_call_operand.vmem [shape: f32[16,32], index: 1, kind: input, shape index: {}]   ;;  %s3383_s2 = inlined_call_operand.hbm [shape: f32[2,32,128], index: 2, kind: input, shape index: {}]   ;;  %s3384_s3 = inlined_call_operand.hbm [shape: f32[2,32,128], index: 3, kind: input, shape index: {}]   ;;  %s3385_s4 = inlined_call_operand.vmem [shape: f32[2,1,128], index: 4, kind: input, shape index: {}]   ;;  %s3386_s5 = inlined_call_operand.vmem [shape: f32[2,2,32], index: 5, kind: input, shape index: {}]   ;;  %s3387_s6 = inlined_call_operand.vmem [shape: f32[2,2,32], index: 6, kind: input, shape index: {}]   ;;  %s3388_s7 = inlined_call_operand.vmem [shape: f32[32,16], index: 7, kind: input, shape index: {}]   ;;  %s3389_s8 = inlined_call_operand.vmem [shape: f32[1,16], index: 8, kind: input, shape index: {}]   ;;  %s3390_s9 = inlined_call_operand.vmem [shape: f32[2,128], index: 9, kind: output, shape index: {0}]   ;;  %s3391_s10 = inlined_call_operand.vmem [shape: f32[2,128], index: 10, kind: output, shape index: {1}]  }
   0x1   :  { %17 = vsyncpa [#allocation5], 0  ;;  %s2955_s13 = smov [#allocation2]   ;;  %s2907_s17 = scalar_lea.hbm %s3383_s2, 1024 }
   0x2   :  { %s27_s14 = sshll.u32 %s2955_s13, 4  ;;  %p2908_p0 = scmp.ne.s32.totalorder %s3383_s2, %s2907_s17  ;;  %s28_s14 = int_to_ptr.vmem [resolvable:$true] %s27_s14 }
   0x3   :  { %p2911_p1 = scmp.lt.u32.totalorder %s2907_s17, %s3383_s2 }
   0x5   :  { %p2913_p2 = pnand %p2911_p1, %p2908_p0 }
   0x7   :  { %2916 = shalt.err (!%p2913_p2)
}
   0x8   :  { %s2917_s22 = scalar_lea.vmem %s28_s14, 1024  ;;  %p2922_p4 = scmp.lt.s32.totalorder %s28_s14, %s28_s14 }
   0x9   :  { %p2918_p3 = scmp.ne.s32.totalorder %s28_s14, %s2917_s22  ;;  %p2923_p5 = scmp.lt.s32.totalorder %s2917_s22, %s2917_s22 }
   0xb   :  { %p2924_p6 = por %p2923_p5, %p2922_p4 }
   0xd   :  { %p2925_p7 = pnand %p2924_p6, %p2918_p3 }
   0xf   :  { %2928 = shalt.err (!%p2925_p7)
}
  0x10   :  { %s2956_s23 = smov 128   ;;  %s2957_s24 = smov 8  }
  0x11   :  { %33 = dma.hbm_to_vmem [thread:$0]  %s3383_s2, 1024, %s28_s14, [#allocation3], %s2956_s23, %s2956_s23, %s2957_s24  }
  0x12   :  { %s2958_s27 = smov [#allocation4]   ;;  %s2929_s11 = scalar_lea.hbm %s3384_s3, 1024 }
  0x13   :  { %s39_s28 = sshll.u32 %s2958_s27, 4  ;;  %p2930_p8 = scmp.ne.s32.totalorder %s3384_s3, %s2929_s11  ;;  %s40_s28 = int_to_ptr.vmem [resolvable:$true] %s39_s28 }
  0x14   :  { %p2933_p9 = scmp.lt.u32.totalorder %s2929_s11, %s3384_s3 }
  0x16   :  { %p2935_p10 = pnand %p2933_p9, %p2930_p8 }
  0x18   :  { %2938 = shalt.err (!%p2935_p10)
}
  0x19   :  { %s2939_s17 = scalar_lea.vmem %s40_s28, 1024  ;;  %p2944_p12 = scmp.lt.s32.totalorder %s40_s28, %s40_s28 }
  0x1a   :  { %p2940_p11 = scmp.ne.s32.totalorder %s40_s28, %s2939_s17  ;;  %p2945_p13 = scmp.lt.s32.totalorder %s2939_s17, %s2939_s17 }
  0x1c   :  { %p2946_p0 = por %p2945_p13, %p2944_p12 }
  0x1e   :  { %p2947_p1 = pnand %p2946_p0, %p2940_p11 }
  0x20   :  { %2950 = shalt.err (!%p2947_p1)
}
  0x21   :  { %45 = dma.hbm_to_vmem [thread:$0]  %s3384_s3, 1024, %s40_s28, [#allocation5], %s2956_s23, %s2956_s23, %s2957_s24  }
  0x22   :  { %2951 = dma.done.wait [#allocation3], 1024  }
  0x23   :  { %2952 = vsyncadd [#allocation3], 4294966272 }
  0x24   :  { %2953 = dma.done.wait [#allocation5], 1024  }
  0x25   :  { %2954 = vsyncadd [#allocation5], 4294966272  ;;  %v2959_v0 = vmov 0   ;;  %v64_v1 = vld [vmem:[%s3381_s0] sm:$0xff]  ;;  %v79_v3 = vld [vmem:[%s3382_s1 + $0x8] sm:$0xff]  ;;  %v2960_v9 = vmov 0.0|0.0   ;;  %v62_v13 = vlaneseq }
  0x26   :  { %2770 = vset.pattern.permute.xlu0 %v2959_v0  ;;  %v78_v2 = vld [vmem:[%s3382_s1] sm:$0xff]  ;;  %v65_v4 = vld [vmem:[%s3381_s0 + $0x8] sm:$0xff]  ;;  %v164_v10 = vld [vmem:[#allocation2 + $0x10] sm:$0xff]  ;;  %vm80_vm0 = vcmask 130048   ;;  %v2961_v18 = vmov 0.0   ;;  %vm177_vm3 = vcmask 261120  }
  0x27   :  { %67 = vperm.xlu0 %2770, %v64_v1   ;;  %v2631_v5 = vpack.c.bf16 %v79_v3, %v78_v2  ;;  %v162_v6 = vld [vmem:[#allocation2] sm:$0xff]  ;;  %v163_v7 = vld [vmem:[#allocation2 + $0x8] sm:$0xff]  ;;  %v165_v11 = vld [vmem:[#allocation2 + $0x18] sm:$0xff]  ;;  %v63_v14 = vand.u32 127, %v62_v13  ;;  %vm2962_vm4 = vmmov 0   ;;  %s2963_s27 = smov 64  }
  0x28   :  { %v2635_v8 = vpack.c.bf16 %v163_v7, %v162_v6  ;;  %v2639_v12 = vpack.c.bf16 %v165_v11, %v164_v10  ;;  %v166_v16 = vld [vmem:[#allocation4] sm:$0xff]  ;;  %v167_v17 = vld [vmem:[#allocation4 + $0x8] sm:$0xff]  ;;  %v168_v23 = vld [vmem:[#allocation4 + $0x10] sm:$0xff]  ;;  %s2964_s30 = smov 32   ;;  %vm1107_vm5 = vcmask 1041408   ;;  %vm1109_vm6 = vcmask 1043456  }
  0x29   :  { %2632 = vmatprep.subr.bf16.mxu0 %v2631_v5  ;;  %v3065_v21 = vpack.c.bf16 %v167_v17, %v166_v16  ;;  %v169_v24 = vld [vmem:[#allocation4 + $0x18] sm:$0xff]  ;;  %v259_v26 = vld [vmem:[%s3386_s5] sm:$0x3]  ;;  %vm1111_vm7 = vcmask 1045504   ;;  %s2967_s25 = smov 16   ;;  %s2968_s3 = smov 48  }
  0x2a   :  { %2634 = vmatpush3.bf16.msra.mxu0 %v2631_v5  ;;  %2636 = vmatprep.subr.bf16.mxu1 %v2635_v8  ;;  %v3071_v25 = vpack.c.bf16 %v169_v24, %v168_v23  ;;  %v2269_v31 = vld [vmem:[%s3385_s4] ss:$0 sm:$0xff]  ;;  %s2969_s23 = smov 112   ;;  %vm2224_vm8 = vcmask 392192   ;;  %vm2226_vm9 = vcmask 523264   ;;  %vm2230_vm10 = vcmask 785408  }
  0x2b   :  { %70 = vperm.xlu0 %2770, %v65_v4   ;;  %2643 = vmatprep.subr.bf16.mxu0 %v2960_v9  ;;  %v260_v38 = vld [vmem:[%s3387_s6] sm:$0x3]  ;;  %vm2228_vm11 = vcmask 654336   ;;  %vm2232_vm12 = vcmask 916480  }
  0x2c   :  { %2638 = vmatpush3.bf16.msra.mxu1 %v2635_v8 }
  0x2d   :  { %2640 = vmatprep.subr.bf16.mxu1 %v2639_v12 }
  0x30   :  { %2642 = vmatpush3.bf16.msra.mxu1 %v2639_v12 }
  0x31   :  { %2649 = vmatprep.subr.bf16.mxu1 %v2960_v9 }
  0xa6   :  { %v68_v15 = vpop.permute.xlu0 %67 }
  0xa7   :  { %vm72_vm1 = vcmp.eq.s32.totalorder %v63_v14, %v68_v15 }
  0xa8   :  { %v2265_v19 = vsel %vm72_vm1, 1.0, %v2961_v18 }
  0xa9   :  { %2419 = vmatprep.mubr.msk.f32.mxu0 %vm80_vm0, %v2265_v19 }
  0xaa   :  { %v71_v20 = vpop.permute.xlu0 %70 }
  0xab   :  { %vm73_vm2 = vcmp.eq.s32.totalorder %v63_v14, %v71_v20 }
  0xac   :  { %v2266_v22 = vsel %vm73_vm2, 1.0, %v2961_v18 }
  0xad   :  { %2420 = vmatmul.mubr.msk.f32.vlgmr.msra.gmra.mrb[0].mxu0 %vm80_vm0, %v2266_v22 }
  0xae   :  { %2645 = vmatpush3.bf16.msra.mxu0 %v3065_v21  ;;  %2441 = vmatprep.mubr.msk.f32.mxu0 %vm2962_vm4, %v2961_v18 }
  0xaf   :  { %2646 = vmatprep.subr.bf16.mxu0 %v2960_v9 }
  0xb2   :  { %2648 = vmatpush3.bf16.msra.mxu0 %v3071_v25 }
  0xb3   :  { %2655 = vmatprep.subr.bf16.mxu0 %v2960_v9 }
  0xb5   :  { %2442 = vmatmul.mubr.msk.f32.vlgmr.msra.gmra.mrb[2].mxu0 %vm177_vm3, %v259_v26 }
  0xb6   :  { %2657 = vmatpush3.bf16.msra.mxu0 %v3065_v21  ;;  %2463 = vmatprep.mubr.msk.f32.mxu0 %vm2962_vm4, %v2961_v18 }
  0xb7   :  { %2658 = vmatprep.subr.bf16.mxu0 %v2960_v9 }
  0xba   :  { %2660 = vmatpush3.bf16.msra.mxu0 %v3071_v25 }
  0xbb   :  { %2667 = vmatprep.subr.bf16.mxu0 %v2960_v9 }
 0x180   :  { %v2421_v27 = vpop.f32.mrb[0].mxu0 }
 0x181   :  { %v153_v28 = vpop.f32.mrb[1].mxu0 }
 0x182   :  { %2430 = vmatprep.mubr.msk.f32.mxu1 %vm177_vm3, %v153_v28 }
 0x183   :  { %2431 = vmatmul.mubr.msk.f32.vlgmr.msra.gmra.mrb[0].mxu1 %vm177_vm3, %v2421_v27 }
 0x184   :  { %2651 = vmatpush3.bf16.msra.mxu1 %v3065_v21  ;;  %2452 = vmatprep.mubr.msk.f32.mxu1 %vm2962_vm4, %v2961_v18 }
 0x185   :  { %2652 = vmatprep.subr.bf16.mxu1 %v2960_v9 }
 0x188   :  { %2654 = vmatpush3.bf16.msra.mxu1 %v3071_v25  ;;  %v330_v29 = vpop.f32.mrb[2].mxu0 }
 0x189   :  { %2661 = vmatprep.subr.bf16.mxu1 %v2960_v9  ;;  %v2443_v30 = vpop.f32.mrb[3].mxu0 }
 0x256   :  { %v2432_v32 = vpop.f32.mrb[0].mxu1 }
 0x257   :  { %v3098_v33 = vadd.f32 %v2432_v32, %v2269_v31  ;;  %v250_v34 = vpop.f32.mrb[1].mxu1 }
 0x258   :  { %v3100_v35 = vadd.f32 %v2269_v31, %v250_v34 }
 0x25a   :  { %v334_v36 = vadd.f32 %v330_v29, %v3100_v35 }
 0x25c   :  { %2771 = vtanh.f32 %v334_v36  ;;  %v2273_v39 = vmul.f32 -1.442695, %v334_v36 }
 0x25e   :  { %2773 = vpow2.f32 %v2273_v39 }
 0x266   :  { %v2772_v37 = vpop.eup %2771 }
 0x267   :  { %348 = vrot.lane.b32.xlu1 %v2772_v37, %s2963_s27 }
 0x268   :  { %v2774_v40 = vpop.eup %2773 }
 0x269   :  { %v338_v41 = vadd.f32 1.0, %v2774_v40 }
 0x26b   :  { %343 = vrot.lane.b32.xlu1 %v260_v38, %s2964_s30  ;;  %2775 = vrcp.f32 %v338_v41 }
 0x275   :  { %v2776_v42 = vpop.eup %2775 }
 0x2d9   :  { %v349_v43 = vpop.permute.xlu1 %348 }
 0x2da   :  { %v351_v44 = vmul.f32 %v2776_v42, %v349_v43 }
 0x2dc   :  { %353 = vrot.lane.b32.xlu0 %v351_v44, %s2964_s30 }
 0x2dd   :  { %v344_v45 = vpop.permute.xlu1 %343 }
 0x2de   :  { %v346_v46 = vmul.f32 %v2776_v42, %v344_v45 }
 0x34e   :  { %v354_v47 = vpop.permute.xlu0 %353 }
 0x34f   :  { %v356_v48 = vadd.f32 %v354_v47, %v346_v46 }
 0x351   :  { %2777 = vtanh.f32 %v356_v48  ;;  %v450_v0 = vrot.slane %v356_v48, 6 }
 0x35b   :  { %v2778_v49 = vpop.eup %2777 }
 0x35c   :  { %359 = vrot.lane.b32.xlu1 %v2778_v49, %s2963_s27 }
 0x3ce   :  { %v360_v50 = vpop.permute.xlu1 %359 }
 0x3cf   :  { %v3110_v51 = vmul.f32 %v2776_v42, %v360_v50 }
 0x3d1   :  { %364 = vrot.lane.b32.xlu0 %v3110_v51, %s2964_s30 }
 0x443   :  { %v365_v52 = vpop.permute.xlu0 %364 }
 0x444   :  { %2453 = vmatmul.mubr.msk.f32.vlgmr.msra.gmra.mrb[2].mxu1 %vm177_vm3, %v365_v52 }
 0x445   :  { %2663 = vmatpush3.bf16.msra.mxu1 %v3065_v21  ;;  %2474 = vmatprep.mubr.msk.f32.mxu1 %vm2962_vm4, %v2961_v18 }
 0x446   :  { %2664 = vmatprep.subr.bf16.mxu1 %v2960_v9 }
 0x449   :  { %2666 = vmatpush3.bf16.msra.mxu1 %v3071_v25 }
 0x44a   :  { %2673 = vmatprep.subr.bf16.mxu1 %v2960_v9 }
 0x517   :  { %v434_v53 = vpop.f32.mrb[2].mxu1 }
 0x518   :  { %v439_v54 = vrot.slane %v434_v53, 6  ;;  %v2454_v55 = vpop.f32.mrb[3].mxu1 }
 0x51a   :  { %v441_v56 = vadd.f32 %v439_v54, %v3100_v35 }
 0x51c   :  { %2779 = vtanh.f32 %v441_v56  ;;  %v2275_v58 = vmul.f32 -1.442695, %v441_v56 }
 0x51e   :  { %2781 = vpow2.f32 %v2275_v58 }
 0x526   :  { %v2780_v57 = vpop.eup %2779 }
 0x527   :  { %454 = vrot.lane.b32.xlu1 %v2780_v57, %s2963_s27 }
 0x528   :  { %v2782_v59 = vpop.eup %2781 }
 0x529   :  { %v445_v60 = vadd.f32 1.0, %v2782_v59 }
 0x52b   :  { %2783 = vrcp.f32 %v445_v60 }
 0x535   :  { %v2784_v61 = vpop.eup %2783 }
 0x536   :  { %v452_v1 = vmul.f32 %v2784_v61, %v450_v0 }
 0x599   :  { %v455_v62 = vpop.permute.xlu1 %454 }
 0x59a   :  { %v457_v63 = vmul.f32 %v2784_v61, %v455_v62 }
 0x59c   :  { %459 = vrot.lane.b32.xlu0 %v457_v63, %s2964_s30 }
 0x60e   :  { %v460_v2 = vpop.permute.xlu0 %459 }
 0x60f   :  { %v462_v3 = vadd.f32 %v460_v2, %v452_v1 }
 0x611   :  { %2785 = vtanh.f32 %v462_v3  ;;  %v557_v23 = vrot.slane %v462_v3, 6 }
 0x61b   :  { %v2786_v4 = vpop.eup %2785 }
 0x61c   :  { %465 = vrot.lane.b32.xlu1 %v2786_v4, %s2963_s27 }
 0x68e   :  { %v466_v5 = vpop.permute.xlu1 %465 }
 0x68f   :  { %v468_v6 = vmul.f32 %v2784_v61, %v466_v5 }
 0x691   :  { %v470_v7 = vrot.slane %v468_v6, 2  ;;  %v1108_v31 = vsel %vm1107_vm5, %v3110_v51, %v468_v6 }
 0x693   :  { %471 = vrot.lane.b32.xlu0 %v470_v7, %s2964_s30 }
 0x705   :  { %v472_v8 = vpop.permute.xlu0 %471 }
 0x706   :  { %2464 = vmatmul.mubr.msk.f32.vlgmr.msra.gmra.mrb[4].mxu0 %vm177_vm3, %v472_v8 }
 0x707   :  { %2669 = vmatpush3.bf16.msra.mxu0 %v3065_v21  ;;  %2485 = vmatprep.mubr.msk.f32.mxu0 %vm2962_vm4, %v2961_v18 }
 0x708   :  { %2670 = vmatprep.subr.bf16.mxu0 %v2960_v9 }
 0x70b   :  { %2672 = vmatpush3.bf16.msra.mxu0 %v3071_v25 }
 0x70c   :  { %2679 = vmatprep.subr.bf16.mxu0 %v2960_v9 }
 0x7d9   :  { %v541_v10 = vpop.f32.mrb[4].mxu0 }
 0x7da   :  { %v546_v11 = vrot.slane %v541_v10, 4  ;;  %v2465_v12 = vpop.f32.mrb[5].mxu0 }
 0x7dc   :  { %v548_v13 = vadd.f32 %v546_v11, %v3100_v35 }
 0x7de   :  { %2787 = vtanh.f32 %v548_v13  ;;  %v2277_v15 = vmul.f32 -1.442695, %v548_v13 }
 0x7e0   :  { %2789 = vpow2.f32 %v2277_v15 }
 0x7e8   :  { %v2788_v14 = vpop.eup %2787 }
 0x7e9   :  { %561 = vrot.lane.b32.xlu1 %v2788_v14, %s2963_s27 }
 0x7ea   :  { %v2790_v16 = vpop.eup %2789 }
 0x7eb   :  { %v552_v17 = vadd.f32 1.0, %v2790_v16 }
 0x7ed   :  { %2791 = vrcp.f32 %v552_v17 }
 0x7f7   :  { %v2792_v19 = vpop.eup %2791 }
 0x7f8   :  { %v559_v24 = vmul.f32 %v2792_v19, %v557_v23 }
 0x85b   :  { %v562_v20 = vpop.permute.xlu1 %561 }
 0x85c   :  { %v564_v22 = vmul.f32 %v2792_v19, %v562_v20 }
 0x85e   :  { %566 = vrot.lane.b32.xlu0 %v564_v22, %s2964_s30 }
 0x8d0   :  { %v567_v26 = vpop.permute.xlu0 %566 }
 0x8d1   :  { %v569_v27 = vadd.f32 %v567_v26, %v559_v24 }
 0x8d3   :  { %2793 = vtanh.f32 %v569_v27  ;;  %v664_v48 = vrot.slane %v569_v27, 6 }
 0x8dd   :  { %v2794_v28 = vpop.eup %2793 }
 0x8de   :  { %572 = vrot.lane.b32.xlu1 %v2794_v28, %s2963_s27 }
 0x950   :  { %v573_v29 = vpop.permute.xlu1 %572 }
 0x951   :  { %v575_v30 = vmul.f32 %v2792_v19, %v573_v29 }
 0x953   :  { %v577_v32 = vrot.slane %v575_v30, 4  ;;  %v1110_v34 = vsel %vm1109_vm6, %v1108_v31, %v575_v30 }
 0x955   :  { %578 = vrot.lane.b32.xlu0 %v577_v32, %s2964_s30 }
 0x9c7   :  { %v579_v36 = vpop.permute.xlu0 %578 }
 0x9c8   :  { %2475 = vmatmul.mubr.msk.f32.vlgmr.msra.gmra.mrb[4].mxu1 %vm177_vm3, %v579_v36 }
 0x9c9   :  { %2675 = vmatpush3.bf16.msra.mxu1 %v3065_v21  ;;  %2496 = vmatprep.mubr.msk.f32.mxu1 %vm2962_vm4, %v2961_v18 }
 0x9ca   :  { %2676 = vmatprep.subr.bf16.mxu1 %v2960_v9 }
 0x9cd   :  { %2678 = vmatpush3.bf16.msra.mxu1 %v3071_v25 }
 0x9ce   :  { %2685 = vmatprep.subr.bf16.mxu1 %v2960_v9 }
 0xa9b   :  { %v648_v37 = vpop.f32.mrb[4].mxu1 }
 0xa9c   :  { %v653_v38 = vrot.slane %v648_v37, 2  ;;  %v2476_v39 = vpop.f32.mrb[5].mxu1 }
 0xa9e   :  { %v655_v40 = vadd.f32 %v653_v38, %v3100_v35 }
 0xaa0   :  { %2795 = vtanh.f32 %v655_v40  ;;  %v2279_v42 = vmul.f32 -1.442695, %v655_v40 }
 0xaa2   :  { %2797 = vpow2.f32 %v2279_v42 }
 0xaaa   :  { %v2796_v41 = vpop.eup %2795 }
 0xaab   :  { %668 = vrot.lane.b32.xlu1 %v2796_v41, %s2963_s27 }
 0xaac   :  { %v2798_v43 = vpop.eup %2797 }
 0xaad   :  { %v659_v44 = vadd.f32 1.0, %v2798_v43 }
 0xaaf   :  { %2799 = vrcp.f32 %v659_v44 }
 0xab9   :  { %v2800_v45 = vpop.eup %2799 }
 0xaba   :  { %v666_v49 = vmul.f32 %v2800_v45, %v664_v48 }
 0xb1d   :  { %v669_v46 = vpop.permute.xlu1 %668 }
 0xb1e   :  { %v671_v47 = vmul.f32 %v2800_v45, %v669_v46 }
 0xb20   :  { %673 = vrot.lane.b32.xlu0 %v671_v47, %s2964_s30 }
 0xb92   :  { %v674_v50 = vpop.permute.xlu0 %673 }
 0xb93   :  { %v676_v51 = vadd.f32 %v674_v50, %v666_v49 }
 0xb95   :  { %2801 = vtanh.f32 %v676_v51  ;;  %v768_v3 = vrot.slane %v676_v51, 6 }
 0xb9f   :  { %v2802_v35 = vpop.eup %2801 }
 0xba0   :  { %679 = vrot.lane.b32.xlu1 %v2802_v35, %s2963_s27 }
 0xc12   :  { %v680_v52 = vpop.permute.xlu1 %679 }
 0xc13   :  { %v682_v53 = vmul.f32 %v2800_v45, %v680_v52 }
 0xc15   :  { %v684_v54 = vrot.slane %v682_v53, 6  ;;  %v3153_v55 = vsel %vm1111_vm7, %v1110_v34, %v682_v53 }
 0xc17   :  { %685 = vrot.lane.b32.xlu0 %v684_v54, %s2964_s30 }
 0xc89   :  { %v686_v56 = vpop.permute.xlu0 %685 }
 0xc8a   :  { %2486 = vmatmul.mubr.msk.f32.vlgmr.msra.gmra.mrb[6].mxu0 %vm177_vm3, %v686_v56 }
 0xc8b   :  { %2681 = vmatpush3.bf16.msra.mxu0 %v3065_v21  ;;  %2507 = vmatprep.mubr.msk.f32.mxu0 %vm2962_vm4, %v2961_v18 }
 0xc8c   :  { %2682 = vmatprep.subr.bf16.mxu0 %v2960_v9 }
 0xc8f   :  { %2684 = vmatpush3.bf16.msra.mxu0 %v3071_v25 }
 0xd5d   :  { %v755_v57 = vpop.f32.mrb[6].mxu0 }
 0xd5e   :  { %v759_v58 = vadd.f32 %v755_v57, %v3098_v33  ;;  %v2487_v59 = vpop.f32.mrb[7].mxu0 }
 0xd60   :  { %2803 = vtanh.f32 %v759_v58  ;;  %v2281_v61 = vmul.f32 -1.442695, %v759_v58 }
 0xd62   :  { %2805 = vpow2.f32 %v2281_v61 }
 0xd6a   :  { %v2804_v60 = vpop.eup %2803 }
 0xd6b   :  { %772 = vrot.lane.b32.xlu1 %v2804_v60, %s2963_s27 }
 0xd6c   :  { %v2806_v62 = vpop.eup %2805 }
 0xd6d   :  { %v763_v63 = vadd.f32 1.0, %v2806_v62 }
 0xd6f   :  { %2807 = vrcp.f32 %v763_v63 }
 0xd79   :  { %v2808_v0 = vpop.eup %2807 }
 0xd7a   :  { %v770_v4 = vmul.f32 %v2808_v0, %v768_v3 }
 0xddd   :  { %v773_v1 = vpop.permute.xlu1 %772 }
 0xdde   :  { %v775_v2 = vmul.f32 %v2808_v0, %v773_v1 }
 0xde0   :  { %777 = vrot.lane.b32.xlu0 %v775_v2, %s2964_s30 }
 0xe52   :  { %v778_v5 = vpop.permute.xlu0 %777 }
 0xe53   :  { %v780_v6 = vadd.f32 %v778_v5, %v770_v4 }
 0xe55   :  { %2809 = vtanh.f32 %v780_v6 }
 0xe5f   :  { %v2810_v7 = vpop.eup %2809 }
 0xe60   :  { %783 = vrot.lane.b32.xlu1 %v2810_v7, %s2963_s27 }
 0xed2   :  { %v784_v8 = vpop.permute.xlu1 %783 }
 0xed3   :  { %v3166_v10 = vmul.f32 %v2808_v0, %v784_v8  ;;  %v1117_v8 = vld [vmem:[#allocation2 + $0x20] sm:$0xff] }
 0xed5   :  { %788 = vrot.lane.b32.xlu0 %v3166_v10, %s2964_s30 }
 0xf47   :  { %v789_v11 = vpop.permute.xlu0 %788 }
 0xf48   :  { %2497 = vmatmul.mubr.msk.f32.vlgmr.msra.gmra.mrb[6].mxu1 %vm177_vm3, %v789_v11  ;;  %v1122_v11 = vld [vmem:[#allocation4 + $0x20] sm:$0xff] }
 0xf49   :  { %2687 = vmatpush3.bf16.msra.mxu1 %v3065_v21  ;;  %2518 = vmatprep.mubr.msk.f32.mxu1 %vm2962_vm4, %v2961_v18 }
 0xf4a   :  { %2688 = vmatprep.subr.bf16.mxu1 %v2960_v9 }
 0xf4d   :  { %2690 = vmatpush3.bf16.msra.mxu1 %v3071_v25  ;;  %v874_v25 = vrot.slane %v780_v6, 6 }
 0xf4e   :  { %2699 = vmatprep.subr.bf16.mxu1 %v2960_v9 }
0x101b   :  { %v858_v12 = vpop.f32.mrb[6].mxu1 }
0x101c   :  { %v863_v13 = vrot.slane %v858_v12, 6  ;;  %v2498_v14 = vpop.f32.mrb[7].mxu1 }
0x101d   :  { %v1119_v14 = vld [vmem:[#allocation2 + $0x30] sm:$0xff] }
0x101e   :  { %v865_v15 = vadd.f32 %v863_v13, %v3098_v33  ;;  %v1123_v13 = vld [vmem:[#allocation4 + $0x28] sm:$0xff] }
0x1020   :  { %2811 = vtanh.f32 %v865_v15  ;;  %v2283_v17 = vmul.f32 -1.442695, %v865_v15  ;;  %v1120_v15 = vld [vmem:[#allocation2 + $0x38] sm:$0xff] }
0x1022   :  { %2813 = vpow2.f32 %v2283_v17  ;;  %v1124_v17 = vld [vmem:[#allocation4 + $0x30] sm:$0xff] }
0x102a   :  { %v2812_v16 = vpop.eup %2811 }
0x102b   :  { %878 = vrot.lane.b32.xlu1 %v2812_v16, %s2963_s27  ;;  %v3203_v16 = vpack.c.bf16 %v1123_v13, %v1122_v11 }
0x102c   :  { %v2814_v21 = vpop.eup %2813 }
0x102d   :  { %v869_v19 = vadd.f32 1.0, %v2814_v21  ;;  %v1125_v21 = vld [vmem:[#allocation4 + $0x38] sm:$0xff] }
0x102f   :  { %2815 = vrcp.f32 %v869_v19  ;;  %v3206_v19 = vpack.c.bf16 %v1125_v21, %v1124_v17 }
0x1039   :  { %v2816_v20 = vpop.eup %2815 }
0x103a   :  { %v876_v24 = vmul.f32 %v2816_v20, %v874_v25 }
0x109d   :  { %v879_v22 = vpop.permute.xlu1 %878 }
0x109e   :  { %v881_v23 = vmul.f32 %v2816_v20, %v879_v22  ;;  %v2292_v22 = vld [vmem:[%s3386_s5 + $0x2] sm:$0x3] }
0x10a0   :  { %883 = vrot.lane.b32.xlu0 %v881_v23, %s2964_s30 }
0x1112   :  { %v884_v26 = vpop.permute.xlu0 %883 }
0x1113   :  { %v886_v27 = vadd.f32 %v884_v26, %v876_v24  ;;  %v2293_v26 = vld [vmem:[%s3387_s6 + $0x2] sm:$0x3] }
0x1115   :  { %2817 = vtanh.f32 %v886_v27  ;;  %v981_v46 = vrot.slane %v886_v27, 6 }
0x111f   :  { %v2818_v28 = vpop.eup %2817 }
0x1120   :  { %889 = vrot.lane.b32.xlu1 %v2818_v28, %s2963_s27 }
0x1192   :  { %v890_v29 = vpop.permute.xlu1 %889 }
0x1193   :  { %v892_v30 = vmul.f32 %v2816_v20, %v890_v29 }
0x1195   :  { %v894_v31 = vrot.slane %v892_v30, 2  ;;  %v1113_v52 = vsel %vm1107_vm5, %v3166_v10, %v892_v30  ;;  %v1118_v10 = vld [vmem:[#allocation2 + $0x28] sm:$0xff]  ;;  %v2289_v30 = vld [vmem:[%s3385_s4 + $0x1] ss:$0 sm:$0xff] }
0x1196   :  { %v2691_v12 = vpack.c.bf16 %v1118_v10, %v1117_v8 }
0x1197   :  { %895 = vrot.lane.b32.xlu0 %v894_v31, %s2964_s30 }
0x1198   :  { %2692 = vmatprep.subr.bf16.mxu0 %v2691_v12 }
0x1209   :  { %v896_v32 = vpop.permute.xlu0 %895 }
0x120a   :  { %2508 = vmatmul.mubr.msk.f32.vlgmr.msra.gmra.mrb[8].mxu0 %vm177_vm3, %v896_v32 }
0x120b   :  { %2694 = vmatpush3.bf16.msra.mxu0 %v2691_v12 }
0x12dd   :  { %v965_v34 = vpop.f32.mrb[8].mxu0 }
0x12de   :  { %v970_v36 = vrot.slane %v965_v34, 4  ;;  %v2509_v37 = vpop.f32.mrb[9].mxu0 }
0x12e0   :  { %v972_v38 = vadd.f32 %v970_v36, %v3098_v33 }
0x12e2   :  { %2819 = vtanh.f32 %v972_v38  ;;  %v2285_v40 = vmul.f32 -1.442695, %v972_v38 }
0x12e4   :  { %2821 = vpow2.f32 %v2285_v40 }
0x12ec   :  { %v2820_v39 = vpop.eup %2819 }
0x12ed   :  { %985 = vrot.lane.b32.xlu1 %v2820_v39, %s2963_s27 }
0x12ee   :  { %v2822_v41 = vpop.eup %2821 }
0x12ef   :  { %v976_v42 = vadd.f32 1.0, %v2822_v41 }
0x12f1   :  { %2823 = vrcp.f32 %v976_v42 }
0x12fb   :  { %v2824_v43 = vpop.eup %2823 }
0x12fc   :  { %v983_v47 = vmul.f32 %v2824_v43, %v981_v46 }
0x135f   :  { %v986_v44 = vpop.permute.xlu1 %985 }
0x1360   :  { %v988_v45 = vmul.f32 %v2824_v43, %v986_v44 }
0x1362   :  { %990 = vrot.lane.b32.xlu0 %v988_v45, %s2964_s30 }
0x13d4   :  { %v991_v48 = vpop.permute.xlu0 %990 }
0x13d5   :  { %v993_v49 = vadd.f32 %v991_v48, %v983_v47 }
0x13d7   :  { %2825 = vtanh.f32 %v993_v49  ;;  %v1088_v4 = vrot.slane %v993_v49, 6 }
0x13e1   :  { %v2826_v50 = vpop.eup %2825 }
0x13e2   :  { %996 = vrot.lane.b32.xlu1 %v2826_v50, %s2963_s27 }
0x1454   :  { %v997_v51 = vpop.permute.xlu1 %996 }
0x1455   :  { %v999_v35 = vmul.f32 %v2824_v43, %v997_v51 }
0x1457   :  { %v1001_v53 = vrot.slane %v999_v35, 4  ;;  %v1114_v54 = vsel %vm1109_vm6, %v1113_v52, %v999_v35 }
0x1459   :  { %1002 = vrot.lane.b32.xlu0 %v1001_v53, %s2964_s30 }
0x14cb   :  { %v1003_v56 = vpop.permute.xlu0 %1002 }
0x14cc   :  { %2519 = vmatmul.mubr.msk.f32.vlgmr.msra.gmra.mrb[8].mxu1 %vm177_vm3, %v1003_v56 }
0x14cd   :  { %2540 = vmatprep.mubr.msk.f32.mxu1 %vm2962_vm4, %v2961_v18  ;;  %2701 = vmatpush3.bf16.msra.mxu1 %v3203_v16 }
0x14ce   :  { %2702 = vmatprep.subr.bf16.mxu1 %v2960_v9 }
0x14d1   :  { %2704 = vmatpush3.bf16.msra.mxu1 %v3206_v19 }
0x14d2   :  { %2711 = vmatprep.subr.bf16.mxu1 %v2960_v9 }
0x14d4   :  { %2541 = vmatmul.mubr.msk.f32.vlgmr.msra.gmra.mrb[10].mxu1 %vm177_vm3, %v2292_v22 }
0x14d5   :  { %2713 = vmatpush3.bf16.msra.mxu1 %v3203_v16  ;;  %2562 = vmatprep.mubr.msk.f32.mxu1 %vm2962_vm4, %v2961_v18 }
0x14d6   :  { %2714 = vmatprep.subr.bf16.mxu1 %v2960_v9 }
0x14d9   :  { %2716 = vmatpush3.bf16.msra.mxu1 %v3206_v19 }
0x14da   :  { %2723 = vmatprep.subr.bf16.mxu1 %v2960_v9 }
0x159f   :  { %v1072_v57 = vpop.f32.mrb[8].mxu1 }
0x15a0   :  { %v1077_v58 = vrot.slane %v1072_v57, 2  ;;  %v2520_v59 = vpop.f32.mrb[9].mxu1 }
0x15a2   :  { %v1079_v60 = vadd.f32 %v1077_v58, %v3098_v33 }
0x15a4   :  { %2827 = vtanh.f32 %v1079_v60  ;;  %v2287_v62 = vmul.f32 -1.442695, %v1079_v60 }
0x15a6   :  { %2829 = vpow2.f32 %v2287_v62 }
0x15a7   :  { %v1292_v28 = vpop.f32.mrb[10].mxu1 }
0x15a8   :  { %v2542_v29 = vpop.f32.mrb[11].mxu1 }
0x15ae   :  { %v2828_v61 = vpop.eup %2827 }
0x15af   :  { %1092 = vrot.lane.b32.xlu1 %v2828_v61, %s2963_s27 }
0x15b0   :  { %v2830_v63 = vpop.eup %2829 }
0x15b1   :  { %v1083_v0 = vadd.f32 1.0, %v2830_v63 }
0x15b3   :  { %2831 = vrcp.f32 %v1083_v0 }
0x15bd   :  { %v2832_v1 = vpop.eup %2831 }
0x15be   :  { %v1090_v5 = vmul.f32 %v2832_v1, %v1088_v4 }
0x1621   :  { %v1093_v2 = vpop.permute.xlu1 %1092 }
0x1622   :  { %v1095_v3 = vmul.f32 %v2832_v1, %v1093_v2 }
0x1624   :  { %1097 = vrot.lane.b32.xlu0 %v1095_v3, %s2964_s30 }
0x1628   :  { %1136 = vrot.lane.b32.xlu0 %v3153_v55, %s2964_s30  ;;  %v2695_v55 = vpack.c.bf16 %v1120_v15, %v1119_v14 }
0x162a   :  { %2696 = vmatprep.subr.bf16.mxu0 %v2695_v55 }
0x162b   :  { %2698 = vmatpush3.bf16.msra.mxu0 %v2695_v55 }
0x162c   :  { %2705 = vmatprep.subr.bf16.mxu0 %v2960_v9 }
0x1696   :  { %v1098_v33 = vpop.permute.xlu0 %1097 }
0x1697   :  { %v3199_v6 = vadd.f32 %v1098_v33, %v1090_v5 }
0x1699   :  { %2833 = vtanh.f32 %v3199_v6 }
0x169a   :  { %v1137_v7 = vpop.permute.xlu0 %1136 }
0x169b   :  { %2529 = vmatprep.mubr.msk.f32.mxu0 %vm177_vm3, %v1137_v7 }
0x16a3   :  { %v2834_v20 = vpop.eup %2833 }
0x16a4   :  { %1103 = vrot.lane.b32.xlu1 %v2834_v20, %s2963_s27 }
0x1716   :  { %v1104_v23 = vpop.permute.xlu1 %1103 }
0x1717   :  { %v3223_v25 = vmul.f32 %v2832_v1, %v1104_v23 }
0x1719   :  { %v1115_v24 = vsel %vm1111_vm7, %v1114_v54, %v3223_v25 }
0x171a   :  { %1138 = vrot.lane.b32.xlu1 %v1115_v24, %s2964_s30 }
0x171e   :  { %1305 = vrot.lane.b32.xlu1 %v2293_v26, %s2964_s30 }
0x178c   :  { %v1139_v27 = vpop.permute.xlu1 %1138 }
0x178d   :  { %2530 = vmatmul.mubr.msk.f32.vlgmr.msra.gmra.mrb[10].mxu0 %vm177_vm3, %v1139_v27 }
0x178e   :  { %2707 = vmatpush3.bf16.msra.mxu0 %v3203_v16  ;;  %2551 = vmatprep.mubr.msk.f32.mxu0 %vm2962_vm4, %v2961_v18 }
0x178f   :  { %2708 = vmatprep.subr.bf16.mxu0 %v2960_v9 }
0x1790   :  { %v1306_v45 = vpop.permute.xlu1 %1305 }
0x1792   :  { %2710 = vmatpush3.bf16.msra.mxu0 %v3206_v19 }
0x1793   :  { %2717 = vmatprep.subr.bf16.mxu0 %v2960_v9 }
0x1860   :  { %v2531_v31 = vpop.f32.mrb[10].mxu0 }
0x1861   :  { %v3242_v32 = vadd.f32 %v2531_v31, %v2289_v30  ;;  %v1210_v34 = vpop.f32.mrb[11].mxu0 }
0x1862   :  { %v3244_v36 = vadd.f32 %v2289_v30, %v1210_v34 }
0x1864   :  { %v1296_v37 = vadd.f32 %v1292_v28, %v3244_v36 }
0x1866   :  { %2835 = vtanh.f32 %v1296_v37  ;;  %v2295_v39 = vmul.f32 -1.442695, %v1296_v37 }
0x1868   :  { %2837 = vpow2.f32 %v2295_v39 }
0x1870   :  { %v2836_v38 = vpop.eup %2835 }
0x1871   :  { %1310 = vrot.lane.b32.xlu0 %v2836_v38, %s2963_s27 }
0x1872   :  { %v2838_v40 = vpop.eup %2837 }
0x1873   :  { %v1300_v41 = vadd.f32 1.0, %v2838_v40 }
0x1875   :  { %2839 = vrcp.f32 %v1300_v41 }
0x187f   :  { %v2840_v42 = vpop.eup %2839 }
0x1880   :  { %v1308_v46 = vmul.f32 %v2840_v42, %v1306_v45 }
0x18e3   :  { %v1311_v43 = vpop.permute.xlu0 %1310 }
0x18e4   :  { %v1313_v44 = vmul.f32 %v2840_v42, %v1311_v43 }
0x18e6   :  { %1315 = vrot.lane.b32.xlu0 %v1313_v44, %s2964_s30 }
0x1958   :  { %v1316_v47 = vpop.permute.xlu0 %1315 }
0x1959   :  { %v1318_v48 = vadd.f32 %v1316_v47, %v1308_v46 }
0x195b   :  { %2841 = vtanh.f32 %v1318_v48  ;;  %v1412_v0 = vrot.slane %v1318_v48, 6 }
0x1965   :  { %v2842_v49 = vpop.eup %2841 }
0x1966   :  { %1321 = vrot.lane.b32.xlu1 %v2842_v49, %s2963_s27 }
0x19d8   :  { %v1322_v50 = vpop.permute.xlu1 %1321 }
0x19d9   :  { %v3250_v51 = vmul.f32 %v2840_v42, %v1322_v50 }
0x19db   :  { %1326 = vrot.lane.b32.xlu0 %v3250_v51, %s2964_s30 }
0x1a4d   :  { %v1327_v35 = vpop.permute.xlu0 %1326 }
0x1a4e   :  { %2552 = vmatmul.mubr.msk.f32.vlgmr.msra.gmra.mrb[12].mxu0 %vm177_vm3, %v1327_v35 }
0x1a4f   :  { %2719 = vmatpush3.bf16.msra.mxu0 %v3203_v16  ;;  %2573 = vmatprep.mubr.msk.f32.mxu0 %vm2962_vm4, %v2961_v18 }
0x1a50   :  { %2720 = vmatprep.subr.bf16.mxu0 %v2960_v9 }
0x1a53   :  { %2722 = vmatpush3.bf16.msra.mxu0 %v3206_v19 }
0x1a54   :  { %2729 = vmatprep.subr.bf16.mxu0 %v2960_v9 }
0x1b21   :  { %v1396_v52 = vpop.f32.mrb[12].mxu0 }
0x1b22   :  { %v1401_v53 = vrot.slane %v1396_v52, 6  ;;  %v2553_v54 = vpop.f32.mrb[13].mxu0 }
0x1b24   :  { %v1403_v56 = vadd.f32 %v1401_v53, %v3244_v36 }
0x1b26   :  { %2843 = vtanh.f32 %v1403_v56  ;;  %v2297_v58 = vmul.f32 -1.442695, %v1403_v56 }
0x1b28   :  { %2845 = vpow2.f32 %v2297_v58 }
0x1b30   :  { %v2844_v57 = vpop.eup %2843 }
0x1b31   :  { %1416 = vrot.lane.b32.xlu1 %v2844_v57, %s2963_s27 }
0x1b32   :  { %v2846_v59 = vpop.eup %2845 }
0x1b33   :  { %v1407_v60 = vadd.f32 1.0, %v2846_v59 }
0x1b35   :  { %2847 = vrcp.f32 %v1407_v60 }
0x1b3f   :  { %v2848_v61 = vpop.eup %2847 }
0x1b40   :  { %v1414_v1 = vmul.f32 %v2848_v61, %v1412_v0 }
0x1ba3   :  { %v1417_v62 = vpop.permute.xlu1 %1416 }
0x1ba4   :  { %v1419_v63 = vmul.f32 %v2848_v61, %v1417_v62 }
0x1ba6   :  { %1421 = vrot.lane.b32.xlu0 %v1419_v63, %s2964_s30 }
0x1c18   :  { %v1422_v2 = vpop.permute.xlu0 %1421 }
0x1c19   :  { %v1424_v3 = vadd.f32 %v1422_v2, %v1414_v1 }
0x1c1b   :  { %2849 = vtanh.f32 %v1424_v3  ;;  %v1519_v23 = vrot.slane %v1424_v3, 6 }
0x1c25   :  { %v2850_v4 = vpop.eup %2849 }
0x1c26   :  { %1427 = vrot.lane.b32.xlu1 %v2850_v4, %s2963_s27 }
0x1c98   :  { %v1428_v5 = vpop.permute.xlu1 %1427 }
0x1c99   :  { %v1430_v33 = vmul.f32 %v2848_v61, %v1428_v5 }
0x1c9b   :  { %v1432_v7 = vrot.slane %v1430_v33, 2  ;;  %v2069_v31 = vsel %vm1107_vm5, %v3250_v51, %v1430_v33 }
0x1c9d   :  { %1433 = vrot.lane.b32.xlu0 %v1432_v7, %s2964_s30 }
0x1d0f   :  { %v1434_v8 = vpop.permute.xlu0 %1433 }
0x1d10   :  { %2563 = vmatmul.mubr.msk.f32.vlgmr.msra.gmra.mrb[12].mxu1 %vm177_vm3, %v1434_v8 }
0x1d11   :  { %2725 = vmatpush3.bf16.msra.mxu1 %v3203_v16  ;;  %2584 = vmatprep.mubr.msk.f32.mxu1 %vm2962_vm4, %v2961_v18 }
0x1d12   :  { %2726 = vmatprep.subr.bf16.mxu1 %v2960_v9 }
0x1d15   :  { %2728 = vmatpush3.bf16.msra.mxu1 %v3206_v19 }
0x1d16   :  { %2735 = vmatprep.subr.bf16.mxu1 %v2960_v9 }
0x1de3   :  { %v1503_v10 = vpop.f32.mrb[12].mxu1 }
0x1de4   :  { %v1508_v11 = vrot.slane %v1503_v10, 4  ;;  %v2564_v12 = vpop.f32.mrb[13].mxu1 }
0x1de6   :  { %v1510_v13 = vadd.f32 %v1508_v11, %v3244_v36 }
0x1de8   :  { %2851 = vtanh.f32 %v1510_v13  ;;  %v2299_v15 = vmul.f32 -1.442695, %v1510_v13 }
0x1dea   :  { %2853 = vpow2.f32 %v2299_v15 }
0x1df2   :  { %v2852_v14 = vpop.eup %2851 }
0x1df3   :  { %1523 = vrot.lane.b32.xlu1 %v2852_v14, %s2963_s27 }
0x1df4   :  { %v2854_v55 = vpop.eup %2853 }
0x1df5   :  { %v1514_v17 = vadd.f32 1.0, %v2854_v55 }
0x1df7   :  { %2855 = vrcp.f32 %v1514_v17 }
0x1e01   :  { %v2856_v21 = vpop.eup %2855 }
0x1e02   :  { %v1521_v24 = vmul.f32 %v2856_v21, %v1519_v23 }
0x1e65   :  { %v1524_v20 = vpop.permute.xlu1 %1523 }
0x1e66   :  { %v1526_v22 = vmul.f32 %v2856_v21, %v1524_v20 }
0x1e68   :  { %1528 = vrot.lane.b32.xlu0 %v1526_v22, %s2964_s30 }
0x1eda   :  { %v1529_v26 = vpop.permute.xlu0 %1528 }
0x1edb   :  { %v1531_v27 = vadd.f32 %v1529_v26, %v1521_v24 }
0x1edd   :  { %2857 = vtanh.f32 %v1531_v27  ;;  %v1626_v50 = vrot.slane %v1531_v27, 6 }
0x1ee7   :  { %v2858_v28 = vpop.eup %2857 }
0x1ee8   :  { %1534 = vrot.lane.b32.xlu1 %v2858_v28, %s2963_s27 }
0x1f5a   :  { %v1535_v29 = vpop.permute.xlu1 %1534 }
0x1f5b   :  { %v1537_v30 = vmul.f32 %v2856_v21, %v1535_v29 }
0x1f5d   :  { %v1539_v34 = vrot.slane %v1537_v30, 4  ;;  %v2070_v37 = vsel %vm1109_vm6, %v2069_v31, %v1537_v30 }
0x1f5f   :  { %1540 = vrot.lane.b32.xlu0 %v1539_v34, %s2964_s30 }
0x1fd1   :  { %v1541_v38 = vpop.permute.xlu0 %1540 }
0x1fd2   :  { %2574 = vmatmul.mubr.msk.f32.vlgmr.msra.gmra.mrb[14].mxu0 %vm177_vm3, %v1541_v38 }
0x1fd3   :  { %2731 = vmatpush3.bf16.msra.mxu0 %v3203_v16  ;;  %2595 = vmatprep.mubr.msk.f32.mxu0 %vm2962_vm4, %v2961_v18 }
0x1fd4   :  { %2732 = vmatprep.subr.bf16.mxu0 %v2960_v9 }
0x1fd7   :  { %2734 = vmatpush3.bf16.msra.mxu0 %v3206_v19 }
0x1fd8   :  { %2741 = vmatprep.subr.bf16.mxu0 %v2960_v9 }
0x20a5   :  { %v1610_v39 = vpop.f32.mrb[14].mxu0 }
0x20a6   :  { %v1615_v40 = vrot.slane %v1610_v39, 2  ;;  %v2575_v41 = vpop.f32.mrb[15].mxu0 }
0x20a8   :  { %v1617_v42 = vadd.f32 %v1615_v40, %v3244_v36 }
0x20aa   :  { %2859 = vtanh.f32 %v1617_v42  ;;  %v2301_v44 = vmul.f32 -1.442695, %v1617_v42 }
0x20ac   :  { %2861 = vpow2.f32 %v2301_v44 }
0x20b4   :  { %v2860_v43 = vpop.eup %2859 }
0x20b5   :  { %1630 = vrot.lane.b32.xlu1 %v2860_v43, %s2963_s27 }
0x20b6   :  { %v2862_v45 = vpop.eup %2861 }
0x20b7   :  { %v1621_v46 = vadd.f32 1.0, %v2862_v45 }
0x20b9   :  { %2863 = vrcp.f32 %v1621_v46 }
0x20c3   :  { %v2864_v47 = vpop.eup %2863 }
0x20c4   :  { %v1628_v51 = vmul.f32 %v2864_v47, %v1626_v50 }
0x2127   :  { %v1631_v48 = vpop.permute.xlu1 %1630 }
0x2128   :  { %v1633_v49 = vmul.f32 %v2864_v47, %v1631_v48 }
0x212a   :  { %1635 = vrot.lane.b32.xlu0 %v1633_v49, %s2964_s30 }
0x219c   :  { %v1636_v35 = vpop.permute.xlu0 %1635 }
0x219d   :  { %v1638_v52 = vadd.f32 %v1636_v35, %v1628_v51 }
0x219f   :  { %2865 = vtanh.f32 %v1638_v52  ;;  %v1730_v5 = vrot.slane %v1638_v52, 6 }
0x21a9   :  { %v2866_v36 = vpop.eup %2865 }
0x21aa   :  { %1641 = vrot.lane.b32.xlu1 %v2866_v36, %s2963_s27 }
0x221c   :  { %v1642_v53 = vpop.permute.xlu1 %1641 }
0x221d   :  { %v1644_v54 = vmul.f32 %v2864_v47, %v1642_v53 }
0x221f   :  { %v1646_v56 = vrot.slane %v1644_v54, 6  ;;  %v3293_v57 = vsel %vm1111_vm7, %v2070_v37, %v1644_v54 }
0x2221   :  { %1647 = vrot.lane.b32.xlu0 %v1646_v56, %s2964_s30 }
0x2293   :  { %v1648_v58 = vpop.permute.xlu0 %1647 }
0x2294   :  { %2585 = vmatmul.mubr.msk.f32.vlgmr.msra.gmra.mrb[14].mxu1 %vm177_vm3, %v1648_v58 }
0x2295   :  { %2737 = vmatpush3.bf16.msra.mxu1 %v3203_v16  ;;  %2606 = vmatprep.mubr.msk.f32.mxu1 %vm2962_vm4, %v2961_v18 }
0x2296   :  { %2738 = vmatprep.subr.bf16.mxu1 %v2960_v9 }
0x2299   :  { %2740 = vmatpush3.bf16.msra.mxu1 %v3206_v19 }
0x2367   :  { %v1717_v59 = vpop.f32.mrb[14].mxu1 }
0x2368   :  { %v1721_v60 = vadd.f32 %v1717_v59, %v3242_v32  ;;  %v2586_v61 = vpop.f32.mrb[15].mxu1 }
0x236a   :  { %2867 = vtanh.f32 %v1721_v60  ;;  %v2303_v63 = vmul.f32 -1.442695, %v1721_v60 }
0x236c   :  { %2869 = vpow2.f32 %v2303_v63 }
0x2374   :  { %v2868_v62 = vpop.eup %2867 }
0x2375   :  { %1734 = vrot.lane.b32.xlu1 %v2868_v62, %s2963_s27 }
0x2376   :  { %v2870_v0 = vpop.eup %2869 }
0x2377   :  { %v1725_v1 = vadd.f32 1.0, %v2870_v0 }
0x2379   :  { %2871 = vrcp.f32 %v1725_v1 }
0x2383   :  { %v2872_v2 = vpop.eup %2871 }
0x2384   :  { %v1732_v33 = vmul.f32 %v2872_v2, %v1730_v5 }
0x23e7   :  { %v1735_v3 = vpop.permute.xlu1 %1734 }
0x23e8   :  { %v1737_v4 = vmul.f32 %v2872_v2, %v1735_v3 }
0x23ea   :  { %1739 = vrot.lane.b32.xlu0 %v1737_v4, %s2964_s30 }
0x245c   :  { %v1740_v7 = vpop.permute.xlu0 %1739 }
0x245d   :  { %v1742_v8 = vadd.f32 %v1740_v7, %v1732_v33 }
0x245f   :  { %2873 = vtanh.f32 %v1742_v8 }
0x2469   :  { %v2874_v10 = vpop.eup %2873 }
0x246a   :  { %1745 = vrot.lane.b32.xlu1 %v2874_v10, %s2963_s27 }
0x24dc   :  { %v1746_v11 = vpop.permute.xlu1 %1745 }
0x24dd   :  { %v3306_v12 = vmul.f32 %v2872_v2, %v1746_v11  ;;  %v2075_v11 = vld [vmem:[%s3388_s7] sm:$0xff] }
0x24df   :  { %1750 = vrot.lane.b32.xlu0 %v3306_v12, %s2964_s30 }
0x2551   :  { %v1751_v13 = vpop.permute.xlu0 %1750 }
0x2552   :  { %2596 = vmatmul.mubr.msk.f32.vlgmr.msra.gmra.mrb[16].mxu0 %vm177_vm3, %v1751_v13 }
0x2553   :  { %2743 = vmatpush3.bf16.msra.mxu0 %v3203_v16  ;;  %2617 = vmatprep.mubr.msk.f32.mxu0 %vm2962_vm4, %v2961_v18 }
0x2554   :  { %2744 = vmatprep.subr.bf16.mxu0 %v2960_v9  ;;  %v1836_v9 = vrot.slane %v1742_v8, 6 }
0x2557   :  { %2746 = vmatpush3.bf16.msra.mxu0 %v3206_v19 }
0x2625   :  { %v1820_v14 = vpop.f32.mrb[16].mxu0 }
0x2626   :  { %v1825_v15 = vrot.slane %v1820_v14, 6  ;;  %v2597_v55 = vpop.f32.mrb[17].mxu0  ;;  %v2078_v14 = vld [vmem:[%s3388_s7 + $0x18] sm:$0xff] }
0x2628   :  { %v1827_v17 = vadd.f32 %v1825_v15, %v3242_v32 }
0x262a   :  { %2875 = vtanh.f32 %v1827_v17  ;;  %v2305_v20 = vmul.f32 -1.442695, %v1827_v17 }
0x262c   :  { %2877 = vpow2.f32 %v2305_v20 }
0x2634   :  { %v2876_v21 = vpop.eup %2875 }
0x2635   :  { %1840 = vrot.lane.b32.xlu1 %v2876_v21, %s2963_s27 }
0x2636   :  { %v2878_v22 = vpop.eup %2877 }
0x2637   :  { %v1831_v16 = vadd.f32 1.0, %v2878_v22 }
0x2639   :  { %2879 = vrcp.f32 %v1831_v16  ;;  %v2310_v16 = vld [vmem:[%s3389_s8] ss:$0 sm:$0xff]  ;;  %s2966_s8 = smov 96  }
0x2643   :  { %v2880_v23 = vpop.eup %2879 }
0x2644   :  { %v1838_v19 = vmul.f32 %v2880_v23, %v1836_v9 }
0x26a7   :  { %v1841_v18 = vpop.permute.xlu1 %1840 }
0x26a8   :  { %v1843_v24 = vmul.f32 %v2880_v23, %v1841_v18 }
0x26aa   :  { %1845 = vrot.lane.b32.xlu0 %v1843_v24, %s2964_s30 }
0x271c   :  { %v1846_v26 = vpop.permute.xlu0 %1845 }
0x271d   :  { %v1848_v27 = vadd.f32 %v1846_v26, %v1838_v19 }
0x271f   :  { %2881 = vtanh.f32 %v1848_v27  ;;  %v1943_v48 = vrot.slane %v1848_v27, 6 }
0x2729   :  { %v2882_v28 = vpop.eup %2881 }
0x272a   :  { %1851 = vrot.lane.b32.xlu1 %v2882_v28, %s2963_s27 }
0x279c   :  { %v1852_v29 = vpop.permute.xlu1 %1851 }
0x279d   :  { %v1854_v30 = vmul.f32 %v2880_v23, %v1852_v29 }
0x279f   :  { %v1856_v31 = vrot.slane %v1854_v30, 2  ;;  %v2072_v53 = vsel %vm1107_vm5, %v3306_v12, %v1854_v30  ;;  %v2076_v12 = vld [vmem:[%s3388_s7 + $0x8] sm:$0xff] }
0x27a0   :  { %v2747_v13 = vpack.c.bf16 %v2076_v12, %v2075_v11 }
0x27a1   :  { %1857 = vrot.lane.b32.xlu0 %v1856_v31, %s2964_s30 }
0x27a2   :  { %2748 = vmatprep.subr.bf16.mxu1 %v2747_v13 }
0x2813   :  { %v1858_v34 = vpop.permute.xlu0 %1857 }
0x2814   :  { %2607 = vmatmul.mubr.msk.f32.vlgmr.msra.gmra.mrb[16].mxu1 %vm177_vm3, %v1858_v34 }
0x2815   :  { %2750 = vmatpush3.bf16.msra.mxu1 %v2747_v13 }
0x28e7   :  { %v1927_v37 = vpop.f32.mrb[16].mxu1 }
0x28e8   :  { %v1932_v38 = vrot.slane %v1927_v37, 4  ;;  %v2608_v39 = vpop.f32.mrb[17].mxu1 }
0x28ea   :  { %v1934_v40 = vadd.f32 %v1932_v38, %v3242_v32 }
0x28ec   :  { %2883 = vtanh.f32 %v1934_v40  ;;  %v2307_v42 = vmul.f32 -1.442695, %v1934_v40 }
0x28ee   :  { %2885 = vpow2.f32 %v2307_v42 }
0x28f6   :  { %v2884_v41 = vpop.eup %2883 }
0x28f7   :  { %1947 = vrot.lane.b32.xlu1 %v2884_v41, %s2963_s27 }
0x28f8   :  { %v2886_v43 = vpop.eup %2885 }
0x28f9   :  { %v1938_v44 = vadd.f32 1.0, %v2886_v43 }
0x28fb   :  { %2887 = vrcp.f32 %v1938_v44 }
0x2905   :  { %v2888_v45 = vpop.eup %2887 }
0x2906   :  { %v1945_v49 = vmul.f32 %v2888_v45, %v1943_v48 }
0x2969   :  { %v1948_v46 = vpop.permute.xlu1 %1947 }
0x296a   :  { %v1950_v47 = vmul.f32 %v2888_v45, %v1948_v46 }
0x296c   :  { %1952 = vrot.lane.b32.xlu0 %v1950_v47, %s2964_s30 }
0x29de   :  { %v1953_v50 = vpop.permute.xlu0 %1952 }
0x29df   :  { %v1955_v51 = vadd.f32 %v1953_v50, %v1945_v49 }
0x29e1   :  { %2889 = vtanh.f32 %v1955_v51  ;;  %v2050_v33 = vrot.slane %v1955_v51, 6 }
0x29eb   :  { %v2890_v35 = vpop.eup %2889 }
0x29ec   :  { %1958 = vrot.lane.b32.xlu1 %v2890_v35, %s2963_s27 }
0x2a5e   :  { %v1959_v52 = vpop.permute.xlu1 %1958 }
0x2a5f   :  { %v1961_v36 = vmul.f32 %v2888_v45, %v1959_v52 }
0x2a61   :  { %v1963_v54 = vrot.slane %v1961_v36, 4  ;;  %v2073_v56 = vsel %vm1109_vm6, %v2072_v53, %v1961_v36 }
0x2a63   :  { %1964 = vrot.lane.b32.xlu0 %v1963_v54, %s2964_s30 }
0x2ad5   :  { %v1965_v58 = vpop.permute.xlu0 %1964 }
0x2ad6   :  { %2618 = vmatmul.mubr.msk.f32.vlgmr.msra.gmra.mrb[18].mxu0 %vm177_vm3, %v1965_v58 }
0x2ba9   :  { %v2034_v59 = vpop.f32.mrb[18].mxu0 }
0x2baa   :  { %v2039_v60 = vrot.slane %v2034_v59, 2  ;;  %v2619_v61 = vpop.f32.mrb[19].mxu0 }
0x2bac   :  { %v2041_v62 = vadd.f32 %v2039_v60, %v3242_v32 }
0x2bae   :  { %2891 = vtanh.f32 %v2041_v62  ;;  %v2309_v0 = vmul.f32 -1.442695, %v2041_v62 }
0x2bb0   :  { %2893 = vpow2.f32 %v2309_v0 }
0x2bb8   :  { %v2892_v63 = vpop.eup %2891 }
0x2bb9   :  { %2054 = vrot.lane.b32.xlu1 %v2892_v63, %s2963_s27 }
0x2bba   :  { %v2894_v1 = vpop.eup %2893 }
0x2bbb   :  { %v2045_v2 = vadd.f32 1.0, %v2894_v1 }
0x2bbd   :  { %2895 = vrcp.f32 %v2045_v2 }
0x2bc7   :  { %v2896_v3 = vpop.eup %2895 }
0x2bc8   :  { %v2052_v7 = vmul.f32 %v2896_v3, %v2050_v33 }
0x2c2b   :  { %v2055_v4 = vpop.permute.xlu1 %2054 }
0x2c2c   :  { %v2057_v5 = vmul.f32 %v2896_v3, %v2055_v4 }
0x2c2e   :  { %2059 = vrot.lane.b32.xlu0 %v2057_v5, %s2964_s30 }
0x2c32   :  { %2088 = vrot.lane.b32.xlu0 %v3293_v57, %s2964_s30  ;;  %v2077_v57 = vld [vmem:[%s3388_s7 + $0x10] sm:$0xff]  ;;  %s2965_s7 = smov 80  }
0x2c33   :  { %v2751_v15 = vpack.c.bf16 %v2078_v14, %v2077_v57 }
0x2c35   :  { %2752 = vmatprep.subr.bf16.mxu1 %v2751_v15 }
0x2c36   :  { %2754 = vmatpush3.bf16.msra.mxu1 %v2751_v15 }
0x2ca0   :  { %v2060_v32 = vpop.permute.xlu0 %2059 }
0x2ca1   :  { %v3336_v8 = vadd.f32 %v2060_v32, %v2052_v7 }
0x2ca3   :  { %2897 = vtanh.f32 %v3336_v8 }
0x2ca4   :  { %v2089_v10 = vpop.permute.xlu0 %2088 }
0x2ca5   :  { %2628 = vmatprep.mubr.msk.f32.mxu1 %vm177_vm3, %v2089_v10 }
0x2cad   :  { %v2898_v55 = vpop.eup %2897 }
0x2cae   :  { %2065 = vrot.lane.b32.xlu1 %v2898_v55, %s2963_s27 }
0x2d20   :  { %v2066_v17 = vpop.permute.xlu1 %2065 }
0x2d21   :  { %v2068_v21 = vmul.f32 %v2896_v3, %v2066_v17 }
0x2d23   :  { %v2074_v20 = vsel %vm1111_vm7, %v2073_v56, %v2068_v21 }
0x2d24   :  { %2090 = vrot.lane.b32.xlu1 %v2074_v20, %s2964_s30 }
0x2d96   :  { %v2091_v22 = vpop.permute.xlu1 %2090 }
0x2d97   :  { %2629 = vmatmul.mubr.msk.f32.vlgmr.msra.gmra.mrb[18].mxu1 %vm177_vm3, %v2091_v22 }
0x2e6a   :  { %v2630_v23 = vpop.f32.mrb[18].mxu1 }
0x2e6b   :  { %v2168_v18 = vadd.f32 %v2630_v23, %v2310_v16  ;;  %v2162_v24 = vpop.f32.mrb[19].mxu1 }
0x2e6c   :  { %v2163_v9 = vadd.f32 %v2310_v16, %v2162_v24 }
0x2e6d   :  { %v2174_v19 = vsel %vm80_vm0, %v2168_v18, -inf }
0x2e6e   :  { %2175 = vmax.xlane.f32.xlu1 %v2174_v19  ;;  %v2171_v26 = vsel %vm80_vm0, %v2163_v9, -inf }
0x2e6f   :  { %2172 = vmax.xlane.f32.xlu0 %v2171_v26 }
0x2e7f   :  { %2236 = vrot.lane.b32.xlu1 %v3223_v25, %s2964_s30 }
0x2efb   :  { %v2176_v27 = vpop.xlane.xlu1 %2175 }
0x2efc   :  { %v2178_v28 = vsub.f32 %v2168_v18, %v2176_v27  ;;  %v2173_v29 = vpop.xlane.xlu0 %2172 }
0x2efd   :  { %v2177_v30 = vsub.f32 %v2163_v9, %v2173_v29 }
0x2efe   :  { %v2181_v31 = vmul.f32 1.442695, %v2178_v28 }
0x2eff   :  { %v2179_v34 = vmul.f32 1.442695, %v2177_v30  ;;  %v2237_v35 = vpop.permute.xlu1 %2236 }
0x2f01   :  { %2899 = vpow2.f32 %v2179_v34 }
0x2f02   :  { %2901 = vpow2.f32 %v2181_v31 }
0x2f0b   :  { %v2900_v37 = vpop.eup %2899 }
0x2f0c   :  { %v2183_v38 = vsel %vm80_vm0, %v2900_v37, 0.0  ;;  %v2902_v39 = vpop.eup %2901 }
0x2f0d   :  { %2184 = vadd.xlane.f32.xlu0 %v2183_v38  ;;  %v2186_v40 = vsel %vm80_vm0, %v2902_v39, 0.0 }
0x2f11   :  { %2187 = vadd.xlane.f32.xlu0 %v2186_v40 }
0x2f27   :  { %2240 = vrot.lane.b32.xlu0 %v2068_v21, %s2963_s27 }
0x2f9a   :  { %v2185_v41 = vpop.xlane.xlu0 %2184 }
0x2f9b   :  { %2903 = vrcp.f32 %v2185_v41 }
0x2f9e   :  { %v2188_v25 = vpop.xlane.xlu0 %2187 }
0x2f9f   :  { %2905 = vrcp.f32 %v2188_v25 }
0x2fa2   :  { %v2241_v52 = vpop.permute.xlu0 %2240 }
0x2fa3   :  { %v2251_v62 = vsel %vm177_vm3, %v2237_v35, %v2241_v52 }
0x2fa5   :  { %v2904_v42 = vpop.eup %2903 }
0x2fa6   :  { %v2191_v45 = vmul.f32 %v2904_v42, %v2900_v37 }
0x2fa8   :  { %v2198_v48 = vrot.slane %v2191_v45, 4  ;;  %v2194_v49 = vrot.slane %v2191_v45, 2  ;;  %v2202_v50 = vrot.slane %v2191_v45, 6 }
0x2fa9   :  { %v2906_v43 = vpop.eup %2905 }
0x2faa   :  { %v2192_v44 = vmul.f32 %v2906_v43, %v2902_v39 }
0x2fac   :  { %2207 = vrot.lane.b32.xlu1 %v2192_v44, %s2963_s27  ;;  %v2210_v46 = vrot.slane %v2192_v44, 2  ;;  %v2214_v47 = vrot.slane %v2192_v44, 4  ;;  %v2218_v51 = vrot.slane %v2192_v44, 6 }
0x2fae   :  { %2211 = vrot.lane.b32.xlu0 %v2210_v46, %s2965_s7 }
0x2fb0   :  { %2215 = vrot.lane.b32.xlu1 %v2214_v47, %s2966_s8 }
0x2fb2   :  { %2199 = vrot.lane.b32.xlu0 %v2198_v48, %s2964_s30 }
0x2fb4   :  { %2195 = vrot.lane.b32.xlu1 %v2194_v49, %s2967_s25 }
0x2fb6   :  { %2244 = vrot.lane.b32.xlu0 %v3199_v6, %s2964_s30 }
0x2fb8   :  { %2203 = vrot.lane.b32.xlu1 %v2202_v50, %s2968_s3 }
0x2fba   :  { %2248 = vrot.lane.b32.xlu0 %v3336_v8, %s2963_s27 }
0x2fbc   :  { %2219 = vrot.lane.b32.xlu1 %v2218_v51, %s2969_s23 }
0x301e   :  { %v2208_v36 = vpop.permute.xlu1 %2207 }
0x3020   :  { %v2212_v53 = vpop.permute.xlu0 %2211 }
0x3022   :  { %v2216_v54 = vpop.permute.xlu1 %2215 }
0x3024   :  { %v2200_v56 = vpop.permute.xlu0 %2199 }
0x3026   :  { %v2196_v58 = vpop.permute.xlu1 %2195 }
0x3027   :  { %v2222_v59 = vsel %vm80_vm0, %v2191_v45, %v2196_v58 }
0x3028   :  { %v2245_v60 = vpop.permute.xlu0 %2244  ;;  %v2223_v61 = vsel %vm177_vm3, %v2222_v59, %v2200_v56 }
0x3029   :  { %v2252_v0 = vsel %vm2226_vm9, %v2251_v62, %v2245_v60 }
0x302a   :  { %v2204_v6 = vpop.permute.xlu1 %2203 }
0x302b   :  { %v2225_v63 = vsel %vm2224_vm8, %v2223_v61, %v2204_v6 }
0x302c   :  { %v2227_v1 = vsel %vm2226_vm9, %v2225_v63, %v2208_v36  ;;  %v2249_v2 = vpop.permute.xlu0 %2248 }
0x302d   :  { %v2253_v3 = vsel %vm2230_vm10, %v2252_v0, %v2249_v2  ;;  %v2229_v4 = vsel %vm2228_vm11, %v2227_v1, %v2212_v53 }
0x302e   :  { %2254 = vst [vmem:[%s3391_s10 - $0x6] sm:$0xc0] %v2253_v3  ;;  %v2220_v5 = vpop.permute.xlu1 %2219  ;;  %v2231_v33 = vsel %vm2230_vm10, %v2229_v4, %v2216_v54 }
0x302f   :  { %v2233_v7 = vsel %vm2232_vm12, %v2231_v33, %v2220_v5 }
0x3030   :  { %2234 = vst [vmem:[%s3390_s9] sm:$0x3] %v2233_v7 }
0x3031   :  { %2263 = vsyncpa [#allocation3], 1 }
0x3032   :  { %2264 = vsyncpa [#allocation5], 1 }

</bundles_post_ra>
